<compile_context>
chip_gen: v5e
topology: v5e:2x2
jax: 0.10.0
libtpu: 0.0.40
codegen_flags: <defaults>
</compile_context>

<pallas_src>
import math

import jax
import jax.numpy as jnp
from jax.experimental import pallas as pl
from jax.experimental.pallas import tpu as pltpu


def _round_up(v, m):
    return ((v + m - 1) // m) * m


_VMEM_LIMIT_CACHE = None


def _vmem_limit_bytes():
    """Generation-aware scoped-VMEM budget (v6e ~90 MiB, v7x ~45 MiB)."""
    global _VMEM_LIMIT_CACHE
    if _VMEM_LIMIT_CACHE is None:
        phys = 128 * 1024 * 1024
        try:
            info = pltpu.get_tpu_info()
            phys = int(getattr(info, "vmem_capacity_bytes", phys))
        except Exception:
            pass
        _VMEM_LIMIT_CACHE = int(min(max(phys * 7 // 10, 32 * 1024 * 1024),
                                    100 * 1024 * 1024))
    return _VMEM_LIMIT_CACHE


def _pick_tile(dim, candidates):
    """Pick the tile minimizing padded size; ties -> largest tile."""
    best = None  # (tile, padded)
    for t in candidates:
        p = _round_up(dim, t)
        if best is None or (p, -t) < (best[1], -best[0]):
            best = (t, p)
    return best


def _largest_dividing_tile(padded, max_tile):
    """Largest multiple of 128 that divides `padded` and is <= max_tile."""
    t = max(128, (min(max_tile, padded) // 128) * 128)
    while t > 128 and padded % t != 0:
        t -= 128
    return t


# ---------------------------------------------------------------------------
# Kernels
# ---------------------------------------------------------------------------
def _masked_weight_kernel(w_ref, b_ref, a_ref, mbin_ref, mw_ref):
    """masked_w tile = (W + (B*scaling) @ A) * binarized_mask  -> bf16.

    W is streamed as bf16, mask as int8 0/1 (bandwidth-bound kernel); the
    add/mask happens in f32.
    """
    lora_w = w_ref[...].astype(jnp.float32) + jnp.dot(
        b_ref[...], a_ref[...], preferred_element_type=jnp.float32)
    mw_ref[...] = (lora_w * mbin_ref[...].astype(jnp.float32)).astype(mw_ref.dtype)


def _linear_bias_kernel(x_ref, w_ref, bias_ref, o_ref):
    """y = x @ w.T + bias; accumulates directly in the resident f32 o_ref."""
    @pl.when(pl.program_id(2) == 0)
    def _():
        o_ref[...] = jnp.broadcast_to(bias_ref[...], o_ref.shape)

    o_ref[...] += jax.lax.dot_general(
        x_ref[...], w_ref[...],
        dimension_numbers=(((1,), (1,)), ((), ())),
        preferred_element_type=jnp.float32)


def _posttrain_kernel(x_ref, w_ref, a_ref, b_ref, bias_ref, o_ref, xa_ref):
    """y = x @ W.T + bias + ((x @ A.T) * scaling) @ B.T  (scaling folded in B).

    xa = x @ A.T is accumulated only while j == 0 and reused from the
    persistent VMEM scratch for j > 0 (grid order: i outer, j, k inner).
    """
    j = pl.program_id(1)
    k = pl.program_id(2)

    @pl.when(k == 0)
    def _():
        o_ref[...] = jnp.broadcast_to(bias_ref[...], o_ref.shape)

    @pl.when((k == 0) & (j == 0))
    def _():
        xa_ref[...] = jnp.zeros_like(xa_ref)

    o_ref[...] += jax.lax.dot_general(
        x_ref[...], w_ref[...],
        dimension_numbers=(((1,), (1,)), ((), ())),
        preferred_element_type=jnp.float32)

    @pl.when(j == 0)
    def _():
        xa_ref[...] += jax.lax.dot_general(
            x_ref[...], a_ref[...],
            dimension_numbers=(((1,), (1,)), ((), ())),
            preferred_element_type=jnp.float32)

    @pl.when(k == pl.num_programs(2) - 1)
    def _():
        o_ref[...] += jax.lax.dot_general(
            xa_ref[...], b_ref[...],            # B already scaled by `scaling`
            dimension_numbers=(((1,), (1,)), ((), ())),
            preferred_element_type=jnp.float32)


# ---------------------------------------------------------------------------
# pallas_call wrappers
# ---------------------------------------------------------------------------
def build_masked_weight(w_bf16, b_scaled, a_f32, mask_i8, *, tn, tk):
    Np, Kp = w_bf16.shape
    rp = a_f32.shape[0]
    return pl.pallas_call(
        _masked_weight_kernel,
        out_shape=jax.ShapeDtypeStruct((Np, Kp), jnp.bfloat16),
        grid=(Np // tn, Kp // tk),
        in_specs=[
            pl.BlockSpec((tn, tk), lambda j, k: (j, k)),   # W (bf16)
            pl.BlockSpec((tn, rp), lambda j, k: (j, 0)),   # B*scaling (f32)
            pl.BlockSpec((rp, tk), lambda j, k: (0, k)),   # A (f32)
            pl.BlockSpec((tn, tk), lambda j, k: (j, k)),   # binarized mask (int8)
        ],
        out_specs=pl.BlockSpec((tn, tk), lambda j, k: (j, k)),
        compiler_params=pltpu.CompilerParams(
            dimension_semantics=("parallel", "parallel"),
            vmem_limit_bytes=_vmem_limit_bytes()),
    )(w_bf16, b_scaled, a_f32, mask_i8)


def linear_bias(x_pad, w_pad, bias_pad, *, tm, tn, tk):
    Mp, Kp = x_pad.shape
    Np = w_pad.shape[0]
    return pl.pallas_call(
        _linear_bias_kernel,
        out_shape=jax.ShapeDtypeStruct((Mp, Np), jnp.float32),
        grid=(Mp // tm, Np // tn, Kp // tk),
        in_specs=[
            pl.BlockSpec((tm, tk), lambda i, j, k: (i, k)),   # x (bf16)
            pl.BlockSpec((tn, tk), lambda i, j, k: (j, k)),   # W (bf16, (N,K))
            pl.BlockSpec((1, tn), lambda i, j, k: (0, j)),    # bias (f32 row)
        ],
        out_specs=pl.BlockSpec((tm, tn), lambda i, j, k: (i, j)),
        compiler_params=pltpu.CompilerParams(
            dimension_semantics=("parallel", "parallel", "arbitrary"),
            vmem_limit_bytes=_vmem_limit_bytes()),
    )(x_pad, w_pad, bias_pad)


def posttrain_linear(x_pad, w_pad, a_pad, b_scaled_pad, bias_pad, *, tm, tn, tk):
    Mp, Kp = x_pad.shape
    Np = w_pad.shape[0]
    rp = a_pad.shape[0]
    return pl.pallas_call(
        _posttrain_kernel,
        out_shape=jax.ShapeDtypeStruct((Mp, Np), jnp.float32),
        grid=(Mp // tm, Np // tn, Kp // tk),
        in_specs=[
            pl.BlockSpec((tm, tk), lambda i, j, k: (i, k)),   # x (bf16)
            pl.BlockSpec((tn, tk), lambda i, j, k: (j, k)),   # W (bf16)
            pl.BlockSpec((rp, tk), lambda i, j, k: (0, k)),   # A (bf16)
            pl.BlockSpec((tn, rp), lambda i, j, k: (j, 0)),   # B*scaling (f32)
            pl.BlockSpec((1, tn), lambda i, j, k: (0, j)),    # bias (f32 row)
        ],
        out_specs=pl.BlockSpec((tm, tn), lambda i, j, k: (i, j)),
        scratch_shapes=[pltpu.VMEM((tm, rp), jnp.float32)],
        compiler_params=pltpu.CompilerParams(
            # j must be sequential: xa computed at j==0 is reused for j>0.
            dimension_semantics=("parallel", "arbitrary", "arbitrary"),
            vmem_limit_bytes=_vmem_limit_bytes()),
    )(x_pad, w_pad, a_pad, b_scaled_pad, bias_pad)


# ---------------------------------------------------------------------------
# Module-equivalent wrapper holding deterministic parameters
# ---------------------------------------------------------------------------
class LoRAPiggybackLinearJAX:
    DEFAULT_THRESHOLD = 0.005

    def __init__(self, in_features, out_features, r=4, lora_alpha=1,
                 mask_scale=0.01, training_type="finetune",
                 finetune_type="lora_piggyback", key=None):
        self.in_features = in_features
        self.out_features = out_features
        self.r = r
        self.scaling = lora_alpha / r
        self.threshold = self.DEFAULT_THRESHOLD
        self.training_type = training_type
        self.finetune_type = finetune_type

        key = jax.random.PRNGKey(0) if key is None else key
        kw, kb, ka, km = jax.random.split(key, 4)

        bound = 1.0 / math.sqrt(in_features)
        self.weight = jax.random.uniform(
            kw, (out_features, in_features), jnp.float32, -bound, bound)
        self.bias = jax.random.uniform(
            kb, (out_features,), jnp.float32, -bound, bound)
        # lora_A: kaiming_uniform(a=sqrt(5)) ~ U(-1/sqrt(in), 1/sqrt(in))
        self.lora_A = jax.random.uniform(
            ka, (r, in_features), jnp.float32, -bound, bound)
        # PyTorch parity: lora_B initialized to zeros (LoRA delta is a no-op).
        self.lora_B = jnp.zeros((out_features, r), jnp.float32)
        # make_mask('weight') with mask_init='uniform', scale=mask_scale
        self.mask = jax.random.uniform(
            km, (out_features, in_features), jnp.float32, -mask_scale, mask_scale)

        # ---- static tiling: minimize padding, lane-dense tiles -------------
        self._tn, self._Np = _pick_tile(out_features, (512, 384, 256, 128))
        self._tk, self._Kp = _pick_tile(in_features, (512, 384, 256, 128))
        self._rp = _round_up(r, 16)     # vreg-dense rank dim for bf16
        # big streaming tiles for the once-per-parameter-set masked-weight build
        self._tn_w = _largest_dividing_tile(self._Np, 512)
        self._tk_w = _largest_dividing_tile(self._Kp, 1024)

        self._refresh_params()

    # ---- padded / preprocessed operands (invalidates the cached masked_w) --
    def _refresh_params(self):
        def pad2(arr, rows, cols):
            return jnp.pad(arr, ((0, rows - arr.shape[0]),
                                 (0, cols - arr.shape[1])))

        self._w_pad_bf16 = pad2(self.weight, self._Np, self._Kp).astype(jnp.bfloat16)
        a_pad = pad2(self.lora_A, self._rp, self._Kp)
        self._a_pad_f32 = a_pad
        self._a_pad_bf16 = a_pad.astype(jnp.bfloat16)
        # fold `scaling` into the rank-r operand (O(N*r) instead of O(N*K))
        self._b_scaled_pad = pad2(self.lora_B * self.scaling, self._Np, self._rp)
        # pre-binarize the mask once (threshold is a constant) -> int8 0/1
        self._mask_bin_pad = pad2(
            (self.mask > self.threshold).astype(jnp.int8), self._Np, self._Kp)
        self._bias_pad = jnp.pad(
            self.bias, (0, self._Np - self.out_features)).reshape(1, self._Np)
        self._masked_w = None   # lazily rebuilt on next piggyback call

    def set_lora_B(self, new_B):
        """Update lora_B (e.g. after training) and invalidate cached operands."""
        self.lora_B = jnp.asarray(new_B, jnp.float32)
        self._refresh_params()

    def __call__(self, x, task_label=0):
        del task_label  # single-adapter ('0') parameters only
        orig_shape = x.shape
        M = math.prod(orig_shape[:-1]) if len(orig_shape) > 1 else 1
        x2d = x.reshape(M, self.in_features)

        if M > 128:
            tm, Mp = _pick_tile(M, (512, 256, 128))
        else:
            tm = _round_up(max(M, 1), 16)
            Mp = tm
        x_pad = jnp.pad(x2d.astype(jnp.bfloat16),
                        ((0, Mp - M), (0, self._Kp - self.in_features)))

        if self.training_type == "posttrain" or (
                self.training_type == "finetune" and self.finetune_type == "lora"):
            out = posttrain_linear(x_pad, self._w_pad_bf16, self._a_pad_bf16,
                                   self._b_scaled_pad, self._bias_pad,
                                   tm=tm, tn=self._tn, tk=self._tk)
        elif (self.training_type == "finetune"
              and self.finetune_type == "lora_piggyback"):
            if self._masked_w is None:
                # parameters are static -> build once and cache (bf16 in HBM)
                self._masked_w = build_masked_weight(
                    self._w_pad_bf16, self._b_scaled_pad, self._a_pad_f32,
                    self._mask_bin_pad, tn=self._tn_w, tk=self._tk_w)
            # keep >=2 "parallel" tiles (v7x has 2 TensorCores) when free
            tn = self._tn
            if (Mp // tm) * (self._Np // tn) < 2 and self._Np >= 256:
                tn = _largest_dividing_tile(self._Np, self._Np // 2)
            out = linear_bias(x_pad, self._masked_w, self._bias_pad,
                              tm=tm, tn=tn, tk=self._tk)
        else:
            # TODO(synk): "full_finetune" (in-place weight merge side effect)
            # and "merge" (stacked-adapter einsum) branches are not wired here.
            raise NotImplementedError((self.training_type, self.finetune_type))

        out = out[:M, :self.out_features]
        return out.reshape(*orig_shape[:-1], self.out_features)

    # ---- pure-JAX references ------------------------------------------------
    def ref_piggyback_f32(self, x2d):
        lora_w = self.weight + self.lora_B @ self.lora_A * self.scaling
        bin_mask = jnp.where(self.mask > self.threshold, 1.0, 0.0)
        return x2d @ (lora_w * bin_mask).T + self.bias

    def ref_piggyback_bf16(self, x2d):
        # mirrors the kernel's quantization: W read as bf16, masked weight bf16, x bf16
        wq = self.weight.astype(jnp.bfloat16).astype(jnp.float32)
        lora_w = wq + (self.lora_B * self.scaling) @ self.lora_A
        bin_mask = jnp.where(self.mask > self.threshold, 1.0, 0.0)
        mw = (lora_w * bin_mask).astype(jnp.bfloat16).astype(jnp.float32)
        xb = x2d.astype(jnp.bfloat16).astype(jnp.float32)
        return xb @ mw.T + self.bias

    def ref_posttrain_f32(self, x2d):
        base = x2d @ self.weight.T + self.bias
        return base + (x2d @ self.lora_A.T) @ self.lora_B.T * self.scaling

    def ref_posttrain_bf16(self, x2d):
        xb = x2d.astype(jnp.bfloat16).astype(jnp.float32)
        wb = self.weight.astype(jnp.bfloat16).astype(jnp.float32)
        ab = self.lora_A.astype(jnp.bfloat16).astype(jnp.float32)
        base = xb @ wb.T + self.bias
        return base + (xb @ ab.T) @ (self.lora_B * self.scaling).T


if __name__ == "__main__":
    key = jax.random.PRNGKey(0)
    kx, kp, kB = jax.random.split(key, 3)

    # Small but tiling-exercising shapes (N=384 -> tn=384 with zero padding,
    # K=512 -> tk=512; grid exercises the K reduction axis).
    batch, seq, in_features, out_features, r = 2, 8, 512, 384, 4
    x = jax.random.normal(kx, (batch, seq, in_features), jnp.float32)
    x2d = x.reshape(-1, in_features)
    lora_B_test = 0.1 * jax.random.normal(kB, (out_features, r), jnp.float32)

    # finetune / lora_piggyback branch (hot path of this module)
    layer_pb = LoRAPiggybackLinearJAX(in_features, out_features, r=r,
                                      training_type="finetune",
                                      finetune_type="lora_piggyback", key=kp)
    # PyTorch inits lora_B to zeros; set small values so the LoRA delta is
    # exercised numerically (also exercises the cache-invalidation path).
    layer_pb.set_lora_B(lora_B_test)
    out_pb = jax.block_until_ready(layer_pb(x, task_label=0))
    assert out_pb.shape == (batch, seq, out_features)
    ref_pb = layer_pb.ref_piggyback_bf16(x2d).reshape(batch, seq, out_features)
    assert jnp.allclose(out_pb, ref_pb, atol=2e-3, rtol=2e-3), \
        float(jnp.max(jnp.abs(out_pb - ref_pb)))
    ref_pb_f32 = layer_pb.ref_piggyback_f32(x2d).reshape(batch, seq, out_features)
    assert jnp.allclose(out_pb, ref_pb_f32, atol=5e-2, rtol=5e-2)
    # second call reuses the cached masked weight (no rebuild kernel launch)
    out_pb2 = jax.block_until_ready(layer_pb(x, task_label=0))
    assert jnp.allclose(out_pb, out_pb2)

    # posttrain branch (same math as finetune/"lora")
    layer_pt = LoRAPiggybackLinearJAX(in_features, out_features, r=r,
                                      training_type="posttrain", key=kp)
    layer_pt.set_lora_B(lora_B_test)
    out_pt = jax.block_until_ready(layer_pt(x, task_label=0))
    ref_pt = layer_pt.ref_posttrain_bf16(x2d).reshape(batch, seq, out_features)
    assert jnp.allclose(out_pt, ref_pt, atol=2e-3, rtol=2e-3), \
        float(jnp.max(jnp.abs(out_pt - ref_pt)))
    ref_pt_f32 = layer_pt.ref_posttrain_f32(x2d).reshape(batch, seq, out_features)
    assert jnp.allclose(out_pt, ref_pt_f32, atol=5e-2, rtol=5e-2)

    print("KERNEL_OK")
</pallas_src>

<mosaic_0001>
module attributes {stable_mosaic.version = 11 : i64} {
  func.func @_masked_weight_kernel(%arg0: i32, %arg1: i32, %arg2: memref<384x512xbf16, #tpu.memory_space<vmem>>, %arg3: memref<384x16xf32, #tpu.memory_space<vmem>>, %arg4: memref<16x512xf32, #tpu.memory_space<vmem>>, %arg5: memref<384x512xi8, #tpu.memory_space<vmem>>, %arg6: memref<384x512xbf16, #tpu.memory_space<vmem>>) attributes {dimension_semantics = [#tpu.dimension_semantics<parallel>, #tpu.dimension_semantics<parallel>], iteration_bounds = array<i64: 1, 1>, scalar_prefetch = 0 : i64, scratch_operands = 0 : i64, tpu.core_type = #tpu.core_type<tc>, window_params = [{transform_indices = @transform_0, window_bounds = array<i64: 384, 512>}, {transform_indices = @transform_1, window_bounds = array<i64: 384, 16>}, {transform_indices = @transform_2, window_bounds = array<i64: 16, 512>}, {transform_indices = @transform_3, window_bounds = array<i64: 384, 512>}, {transform_indices = @transform_4, window_bounds = array<i64: 384, 512>}]} {
    %c0 = arith.constant 0 : index
    %c0_0 = arith.constant 0 : index
    %0 = vector.load %arg2[%c0, %c0_0] : memref<384x512xbf16, #tpu.memory_space<vmem>>, vector<384x512xbf16>
    %1 = arith.extf %0 : vector<384x512xbf16> to vector<384x512xf32>
    %c0_1 = arith.constant 0 : index
    %c0_2 = arith.constant 0 : index
    %2 = vector.load %arg3[%c0_1, %c0_2] : memref<384x16xf32, #tpu.memory_space<vmem>>, vector<384x16xf32>
    %c0_3 = arith.constant 0 : index
    %c0_4 = arith.constant 0 : index
    %3 = vector.load %arg4[%c0_3, %c0_4] : memref<16x512xf32, #tpu.memory_space<vmem>>, vector<16x512xf32>
    %cst = arith.constant dense<0.000000e+00> : vector<384x512xf32>
    %4 = tpu.matmul %2, %3, %cst {dimension_numbers = #tpu.dot_dimension_numbers<[1], [0], [0], [1], [0, 0, 1, 1], [], []>} : vector<384x16xf32>, vector<16x512xf32>, vector<384x512xf32> -> vector<384x512xf32>
    %5 = arith.addf %1, %4 : vector<384x512xf32>
    %c0_5 = arith.constant 0 : index
    %c0_6 = arith.constant 0 : index
    %6 = vector.load %arg5[%c0_5, %c0_6] : memref<384x512xi8, #tpu.memory_space<vmem>>, vector<384x512xi8>
    %7 = arith.sitofp %6 : vector<384x512xi8> to vector<384x512xf32>
    %8 = arith.mulf %5, %7 : vector<384x512xf32>
    %9 = arith.truncf %8 : vector<384x512xf32> to vector<384x512xbf16>
    %c0_7 = arith.constant 0 : index
    %c0_8 = arith.constant 0 : index
    %10 = vector.load %arg6[%c0_7, %c0_8] : memref<384x512xbf16, #tpu.memory_space<vmem>>, vector<384x512xbf16>
    tpu.vector_store %arg6[%c0_7, %c0_8], %9 {strides = array<i32>} : memref<384x512xbf16, #tpu.memory_space<vmem>>, vector<384x512xbf16>,
    return
  }
  func.func @transform_0(%arg0: i32, %arg1: i32) -> (i32, i32) {
    %c0_i32 = arith.constant 0 : i32
    return %arg0, %arg1 : i32, i32
  }
  func.func @transform_1(%arg0: i32, %arg1: i32) -> (i32, i32) {
    %c0_i32 = arith.constant 0 : i32
    %c0_i32_0 = arith.constant 0 : i32
    return %arg0, %c0_i32 : i32, i32
  }
  func.func @transform_2(%arg0: i32, %arg1: i32) -> (i32, i32) {
    %c0_i32 = arith.constant 0 : i32
    %c0_i32_0 = arith.constant 0 : i32
    return %c0_i32, %arg1 : i32, i32
  }
  func.func @transform_3(%arg0: i32, %arg1: i32) -> (i32, i32) {
    %c0_i32 = arith.constant 0 : i32
    return %arg0, %arg1 : i32, i32
  }
  func.func @transform_4(%arg0: i32, %arg1: i32) -> (i32, i32) {
    %c0_i32 = arith.constant 0 : i32
    return %arg0, %arg1 : i32, i32
  }
}

</mosaic_0001>

<bundles_post_ra>
// kernel: tpu_custom_call.1
= control target key start
LH: loop header
LB: loop body
LE: loop exit
PB: predicated region body
PF: predicated region fallthrough
CT: control target
= control target key end

     0   :  { %9 = vsyncpa [#allocation3], 0  ;;  %s3303_s0 = inlined_call_operand.hbm [shape: bf16[384,512], index: 0, kind: input, shape index: {}]   ;;  %s3304_s1 = inlined_call_operand.vmem [shape: f32[384,16], index: 1, kind: input, shape index: {}]   ;;  %s3305_s2 = inlined_call_operand.hbm [shape: f32[16,512], index: 2, kind: input, shape index: {}]   ;;  %s3306_s3 = inlined_call_operand.vmem [shape: s8[384,512], index: 3, kind: input, shape index: {}]   ;;  %s3307_s4 = inlined_call_operand.hbm [shape: bf16[384,512], index: 4, kind: output, shape index: {}]  }
   0x1   :  { %10 = vsyncpa [#allocation6], 0 }
   0x2   :  { %11 = vsyncpa [#allocation4], 0  ;;  %s16_s17 = sshll.u32 %s3303_s0, 4  ;;  %s2488_s18 = smov [#allocation2]   ;;  %s17_s17 = int_to_ptr.hbm [resolvable:$true] %s16_s17 }
   0x3   :  { %s18_s19 = sshll.u32 %s2488_s18, 4  ;;  %s31_s22 = sshll.u32 %s3305_s2, 4  ;;  %s19_s19 = int_to_ptr.vmem [resolvable:$true] %s18_s19  ;;  %s32_s22 = int_to_ptr.hbm [resolvable:$true] %s31_s22 }
   0x4   :  { %s2489_s23 = smov 256   ;;  %s2490_s24 = smov 16  }
   0x5   :  { %24 = dma.hbm_to_vmem [thread:$0]  %s17_s17, 12288, %s19_s19, [#allocation3], %s2489_s23, %s2489_s23, %s2490_s24  }
   0x6   :  { %s2491_s25 = smov [#allocation5]   ;;  %s2492_s27 = smov 512  }
   0x7   :  { %s33_s26 = sshll.u32 %s2491_s25, 4  ;;  %s2493_s0 = smov 32   ;;  %s34_s26 = int_to_ptr.vmem [resolvable:$true] %s33_s26 }
   0x8   :  { %39 = dma.hbm_to_vmem [thread:$0]  %s32_s22, 1024, %s34_s26, [#allocation6], %s2492_s27, %s2492_s27, %s2493_s0  }
   0x9   :  { %2482 = dma.done.wait [#allocation3], 12288  }
   0xa   :  { %2483 = vsyncadd [#allocation3], 4294955008 }
   0xb   :  { %2484 = dma.done.wait [#allocation6], 1024  }
   0xc   :  { %2485 = vsyncadd [#allocation6], 4294966272  ;;  %v392_v0 = vld [vmem:[#allocation5 + $0x30] sm:$0xff]  ;;  %v393_v1 = vld [vmem:[#allocation5 + $0x38] sm:$0xff]  ;;  %vm394_vm0 = vcmask 130048   ;;  %s2197_s12 = sshll.u32 %s3307_s4, 4  ;;  %s2198_s12 = int_to_ptr.hbm [resolvable:$true] %s2197_s12 }
   0xd   :  { %v388_v2 = vld [vmem:[#allocation5 + $0x10] sm:$0xff]  ;;  %875 = vmatpush.msra.mxu2 %v392_v0  ;;  %1036 = vmatpush.msra.mxu3 %v393_v1  ;;  %v389_v3 = vld [vmem:[#allocation5 + $0x18] sm:$0xff]  ;;  %v338_v4 = vld [vmem:[%s3304_s1] sm:$0xff] }
   0xe   :  { %v390_v5 = vld [vmem:[#allocation5 + $0x20] sm:$0xff]  ;;  %v391_v6 = vld [vmem:[#allocation5 + $0x28] sm:$0xff]  ;;  %v340_v10 = vld [vmem:[%s3304_s1 + $0x10] sm:$0xff] }
   0xf   :  { %553 = vmatpush.msra.mxu0 %v390_v5  ;;  %v386_v7 = vld [vmem:[#allocation5] sm:$0xff]  ;;  %876 = vmatpush.msra.mxu2 %v388_v2  ;;  %v387_v8 = vld [vmem:[#allocation5 + $0x8] sm:$0xff]  ;;  %v341_v11 = vld [vmem:[%s3304_s1 + $0x18] sm:$0xff] }
  0x10   :  { %1037 = vmatpush.msra.mxu3 %v389_v3  ;;  %2307 = vmatmul.msk.f32.vlgmr.msra.gmra.mxu2 %vm394_vm0, %v338_v4  ;;  %v339_v9 = vld [vmem:[%s3304_s1 + $0x8] sm:$0xff]  ;;  %v342_v12 = vld [vmem:[%s3304_s1 + $0x20] sm:$0xff]  ;;  %v344_v14 = vld [vmem:[%s3304_s1 + $0x30] sm:$0xff] }
  0x11   :  { %2355 = vmatmul.msk.f32.vlgmr.msra.gmra.mxu3 %vm394_vm0, %v338_v4  ;;  %714 = vmatpush.msra.mxu1 %v391_v6  ;;  %v343_v13 = vld [vmem:[%s3304_s1 + $0x28] sm:$0xff]  ;;  %v345_v15 = vld [vmem:[%s3304_s1 + $0x38] sm:$0xff]  ;;  %v346_v16 = vld [vmem:[%s3304_s1 + $0x40] sm:$0xff] }
  0x12   :  { %554 = vmatpush.msra.mxu0 %v386_v7  ;;  %v347_v17 = vld [vmem:[%s3304_s1 + $0x48] sm:$0xff]  ;;  %v348_v18 = vld [vmem:[%s3304_s1 + $0x50] sm:$0xff]  ;;  %v349_v19 = vld [vmem:[%s3304_s1 + $0x58] sm:$0xff] }
  0x13   :  { %2211 = vmatmul.msk.f32.vlgmr.msra.gmra.mxu0 %vm394_vm0, %v338_v4  ;;  %715 = vmatpush.msra.mxu1 %v387_v8  ;;  %v350_v20 = vld [vmem:[%s3304_s1 + $0x60] sm:$0xff]  ;;  %v351_v21 = vld [vmem:[%s3304_s1 + $0x68] sm:$0xff]  ;;  %v352_v22 = vld [vmem:[%s3304_s1 + $0x70] sm:$0xff] }
  0x14   :  { %2259 = vmatmul.msk.f32.vlgmr.msra.gmra.mxu1 %vm394_vm0, %v338_v4  ;;  %v353_v23 = vld [vmem:[%s3304_s1 + $0x78] sm:$0xff]  ;;  %v2640_v24 = vld [vmem:[%s3306_s3] sm:$0xff]  ;;  %v2647_v26 = vld [vmem:[%s3306_s3 + $0x8] sm:$0xff] }
  0x15   :  { %v50_v25 = vld [vmem:[#allocation2] sm:$0xff]  ;;  %v1423_v27 = vunpack.c.0.s8 %v2640_v24  ;;  %v2654_v28 = vld [vmem:[%s3306_s3 + $0x10] sm:$0xff]  ;;  %v2659_v29 = vld [vmem:[%s3306_s3 + $0x18] sm:$0xff]  ;;  %v1424_v31 = vunpack.c.0.s8 %v2647_v26  ;;  %v1427_v49 = vunpack.c.1.s8 %v2640_v24  ;;  %v1428_v56 = vunpack.c.1.s8 %v2647_v26 }
  0x16   :  { %v146_v30 = vunpack.c.l.bf16 %v50_v25  ;;  %v354_v32 = vld [vmem:[%s3304_s1 + $0x80] sm:$0xff]  ;;  %v51_v33 = vld [vmem:[#allocation2 + $0x8] sm:$0xff]  ;;  %v1425_v34 = vunpack.c.0.s8 %v2654_v28  ;;  %v147_v36 = vunpack.c.h.bf16 %v50_v25  ;;  %v1426_v37 = vunpack.c.0.s8 %v2659_v29  ;;  %v52_v43 = vld [vmem:[#allocation2 + $0x10] sm:$0xff] }
  0x17   :  { %v1615_v35 = vcvt.s32.f32 %v1423_v27  ;;  %v1616_v40 = vcvt.s32.f32 %v1424_v31  ;;  %v148_v41 = vunpack.c.l.bf16 %v51_v33  ;;  %v149_v42 = vunpack.c.h.bf16 %v51_v33  ;;  %v53_v57 = vld [vmem:[#allocation2 + $0x18] sm:$0xff]  ;;  %v355_v58 = vld [vmem:[%s3304_s1 + $0x88] sm:$0xff]  ;;  %v54_v8 = vld [vmem:[#allocation2 + $0x20] sm:$0xff] }
  0x18   :  { %2308 = vmatmul.msk.f32.gmra.mxu2 %vm394_vm0, %v339_v9  ;;  %v1617_v45 = vcvt.s32.f32 %v1425_v34  ;;  %v1618_v48 = vcvt.s32.f32 %v1426_v37  ;;  %v150_v52 = vunpack.c.l.bf16 %v52_v43  ;;  %v151_v59 = vunpack.c.h.bf16 %v52_v43 }
  0x19   :  { %2356 = vmatmul.msk.f32.gmra.mxu3 %vm394_vm0, %v339_v9  ;;  %v1429_v60 = vunpack.c.1.s8 %v2654_v28  ;;  %v1430_v61 = vunpack.c.1.s8 %v2659_v29  ;;  %v1619_v1 = vcvt.s32.f32 %v1427_v49  ;;  %v152_v3 = vunpack.c.l.bf16 %v53_v57 }
  0x1a   :  { %v1620_v6 = vcvt.s32.f32 %v1428_v56  ;;  %v153_v7 = vunpack.c.h.bf16 %v53_v57  ;;  %v155_v25 = vunpack.c.h.bf16 %v54_v8  ;;  %v1433_v27 = vunpack.c.2.s8 %v2654_v28  ;;  %v357_v56 = vld [vmem:[%s3304_s1 + $0x98] sm:$0xff] }
  0x1b   :  { %2212 = vmatmul.msk.f32.gmra.mxu0 %vm394_vm0, %v339_v9 }
  0x1c   :  { %2260 = vmatmul.msk.f32.gmra.mxu1 %vm394_vm0, %v339_v9  ;;  %v1625_v43 = vcvt.s32.f32 %v1433_v27 }
  0x20   :  { %2309 = vmatmul.msk.f32.gmra.mxu2 %vm394_vm0, %v340_v10 }
  0x21   :  { %2357 = vmatmul.msk.f32.gmra.mxu3 %vm394_vm0, %v340_v10 }
  0x23   :  { %2213 = vmatmul.msk.f32.gmra.mxu0 %vm394_vm0, %v340_v10 }
  0x24   :  { %2261 = vmatmul.msk.f32.gmra.mxu1 %vm394_vm0, %v340_v10  ;;  %v1621_v10 = vcvt.s32.f32 %v1429_v60 }
  0x28   :  { %2310 = vmatmul.msk.f32.gmra.mxu2 %vm394_vm0, %v341_v11 }
  0x29   :  { %2358 = vmatmul.msk.f32.gmra.mxu3 %vm394_vm0, %v341_v11 }
  0x2b   :  { %2214 = vmatmul.msk.f32.gmra.mxu0 %vm394_vm0, %v341_v11 }
  0x2c   :  { %2262 = vmatmul.msk.f32.gmra.mxu1 %vm394_vm0, %v341_v11 }
  0x30   :  { %2311 = vmatmul.msk.f32.gmra.mxu2 %vm394_vm0, %v342_v12 }
  0x31   :  { %2359 = vmatmul.msk.f32.gmra.mxu3 %vm394_vm0, %v342_v12 }
  0x33   :  { %2215 = vmatmul.msk.f32.gmra.mxu0 %vm394_vm0, %v342_v12 }
  0x34   :  { %2263 = vmatmul.msk.f32.gmra.mxu1 %vm394_vm0, %v342_v12 }
  0x38   :  { %2312 = vmatmul.msk.f32.gmra.mxu2 %vm394_vm0, %v343_v13 }
  0x39   :  { %2360 = vmatmul.msk.f32.gmra.mxu3 %vm394_vm0, %v343_v13 }
  0x3b   :  { %2216 = vmatmul.msk.f32.gmra.mxu0 %vm394_vm0, %v343_v13 }
  0x3c   :  { %2264 = vmatmul.msk.f32.gmra.mxu1 %vm394_vm0, %v343_v13  ;;  %v1622_v13 = vcvt.s32.f32 %v1430_v61 }
  0x40   :  { %2313 = vmatmul.msk.f32.gmra.mxu2 %vm394_vm0, %v344_v14 }
  0x41   :  { %2361 = vmatmul.msk.f32.gmra.mxu3 %vm394_vm0, %v344_v14 }
  0x43   :  { %2217 = vmatmul.msk.f32.gmra.mxu0 %vm394_vm0, %v344_v14 }
  0x44   :  { %2265 = vmatmul.msk.f32.gmra.mxu1 %vm394_vm0, %v344_v14  ;;  %v1431_v14 = vunpack.c.2.s8 %v2640_v24 }
  0x46   :  { %v1623_v34 = vcvt.s32.f32 %v1431_v14 }
  0x48   :  { %2314 = vmatmul.msk.f32.gmra.mxu2 %vm394_vm0, %v345_v15 }
  0x49   :  { %2362 = vmatmul.msk.f32.gmra.mxu3 %vm394_vm0, %v345_v15 }
  0x4b   :  { %2218 = vmatmul.msk.f32.gmra.mxu0 %vm394_vm0, %v345_v15 }
  0x4c   :  { %2266 = vmatmul.msk.f32.gmra.mxu1 %vm394_vm0, %v345_v15 }
  0x50   :  { %2315 = vmatmul.msk.f32.gmra.mxu2 %vm394_vm0, %v346_v16 }
  0x51   :  { %2363 = vmatmul.msk.f32.gmra.mxu3 %vm394_vm0, %v346_v16 }
  0x53   :  { %2219 = vmatmul.msk.f32.gmra.mxu0 %vm394_vm0, %v346_v16 }
  0x54   :  { %2267 = vmatmul.msk.f32.gmra.mxu1 %vm394_vm0, %v346_v16 }
  0x58   :  { %2316 = vmatmul.msk.f32.gmra.mxu2 %vm394_vm0, %v347_v17 }
  0x59   :  { %2364 = vmatmul.msk.f32.gmra.mxu3 %vm394_vm0, %v347_v17 }
  0x5b   :  { %2220 = vmatmul.msk.f32.gmra.mxu0 %vm394_vm0, %v347_v17 }
  0x5c   :  { %2268 = vmatmul.msk.f32.gmra.mxu1 %vm394_vm0, %v347_v17  ;;  %v154_v17 = vunpack.c.l.bf16 %v54_v8 }
  0x60   :  { %2317 = vmatmul.msk.f32.gmra.mxu2 %vm394_vm0, %v348_v18 }
  0x61   :  { %2365 = vmatmul.msk.f32.gmra.mxu3 %vm394_vm0, %v348_v18 }
  0x63   :  { %2221 = vmatmul.msk.f32.gmra.mxu0 %vm394_vm0, %v348_v18 }
  0x64   :  { %2269 = vmatmul.msk.f32.gmra.mxu1 %vm394_vm0, %v348_v18 }
  0x68   :  { %2318 = vmatmul.msk.f32.gmra.mxu2 %vm394_vm0, %v349_v19 }
  0x69   :  { %2366 = vmatmul.msk.f32.gmra.mxu3 %vm394_vm0, %v349_v19 }
  0x6b   :  { %2222 = vmatmul.msk.f32.gmra.mxu0 %vm394_vm0, %v349_v19 }
  0x6c   :  { %2270 = vmatmul.msk.f32.gmra.mxu1 %vm394_vm0, %v349_v19 }
  0x70   :  { %2319 = vmatmul.msk.f32.gmra.mxu2 %vm394_vm0, %v350_v20 }
  0x71   :  { %2367 = vmatmul.msk.f32.gmra.mxu3 %vm394_vm0, %v350_v20 }
  0x73   :  { %2223 = vmatmul.msk.f32.gmra.mxu0 %vm394_vm0, %v350_v20 }
  0x74   :  { %2271 = vmatmul.msk.f32.gmra.mxu1 %vm394_vm0, %v350_v20 }
  0x78   :  { %2320 = vmatmul.msk.f32.gmra.mxu2 %vm394_vm0, %v351_v21 }
  0x79   :  { %2368 = vmatmul.msk.f32.gmra.mxu3 %vm394_vm0, %v351_v21 }
  0x7b   :  { %2224 = vmatmul.msk.f32.gmra.mxu0 %vm394_vm0, %v351_v21 }
  0x7c   :  { %2272 = vmatmul.msk.f32.gmra.mxu1 %vm394_vm0, %v351_v21  ;;  %v1432_v21 = vunpack.c.2.s8 %v2647_v26 }
  0x80   :  { %2321 = vmatmul.msk.f32.gmra.mxu2 %vm394_vm0, %v352_v22 }
  0x81   :  { %2369 = vmatmul.msk.f32.gmra.mxu3 %vm394_vm0, %v352_v22 }
  0x83   :  { %2225 = vmatmul.msk.f32.gmra.mxu0 %vm394_vm0, %v352_v22 }
  0x84   :  { %2273 = vmatmul.msk.f32.gmra.mxu1 %vm394_vm0, %v352_v22  ;;  %v55_v22 = vld [vmem:[#allocation2 + $0x28] sm:$0xff] }
  0x88   :  { %2322 = vmatmul.msk.f32.gmra.mxu2 %vm394_vm0, %v353_v23 }
  0x89   :  { %2370 = vmatmul.msk.f32.gmra.mxu3 %vm394_vm0, %v353_v23 }
  0x8b   :  { %2226 = vmatmul.msk.f32.gmra.mxu0 %vm394_vm0, %v353_v23 }
  0x8c   :  { %2274 = vmatmul.msk.f32.gmra.mxu1 %vm394_vm0, %v353_v23  ;;  %v356_v23 = vld [vmem:[%s3304_s1 + $0x90] sm:$0xff] }
  0x90   :  { %v556_v38 = vpop.f32.mrf.mxu0  ;;  %2323 = vmatmul.msk.f32.gmra.mxu2 %vm394_vm0, %v354_v32 }
  0x91   :  { %2371 = vmatmul.msk.f32.gmra.mxu3 %vm394_vm0, %v354_v32  ;;  %v1183_v39 = vadd.f32 %v556_v38, %v146_v30  ;;  %v717_v44 = vpop.f32.mrf.mxu1  ;;  %v1434_v30 = vunpack.c.2.s8 %v2659_v29 }
  0x92   :  { %v1184_v47 = vadd.f32 %v717_v44, %v147_v36  ;;  %v156_v36 = vunpack.c.l.bf16 %v55_v22 }
  0x93   :  { %v1807_v46 = vmul.f32 %v1615_v35, %v1183_v39  ;;  %2227 = vmatmul.msk.f32.gmra.mxu0 %vm394_vm0, %v354_v32  ;;  %v878_v50 = vpop.f32.mrf.mxu2  ;;  %v1624_v39 = vcvt.s32.f32 %v1432_v21  ;;  %v358_v21 = vld [vmem:[%s3304_s1 + $0xa0] sm:$0xff] }
  0x94   :  { %v1039_v51 = vpop.f32.mrf.mxu3  ;;  %v1808_v53 = vmul.f32 %v1616_v40, %v1184_v47  ;;  %v1185_v54 = vadd.f32 %v878_v50, %v148_v41  ;;  %2275 = vmatmul.msk.f32.gmra.mxu1 %vm394_vm0, %v354_v32  ;;  %v157_v40 = vunpack.c.h.bf16 %v55_v22  ;;  %v56_v41 = vld [vmem:[#allocation2 + $0x30] sm:$0xff]  ;;  %v1435_v47 = vunpack.c.3.s8 %v2640_v24 }
  0x95   :  { %v1186_v55 = vadd.f32 %v1039_v51, %v149_v42  ;;  %v158_v50 = vunpack.c.l.bf16 %v56_v41  ;;  %v159_v57 = vunpack.c.h.bf16 %v56_v41  ;;  %v1438_v24 = vunpack.c.3.s8 %v2659_v29 }
  0x96   :  { %v1999_v62 = vpack.c.bf16 %v1808_v53, %v1807_v46  ;;  %v1809_v63 = vmul.f32 %v1617_v45, %v1185_v54  ;;  %v1626_v46 = vcvt.s32.f32 %v1434_v30  ;;  %v1436_v54 = vunpack.c.3.s8 %v2647_v26 }
  0x97   :  { %v1810_v0 = vmul.f32 %v1618_v48, %v1186_v55  ;;  %v57_v55 = vld [vmem:[#allocation2 + $0x38] sm:$0xff] }
  0x98   :  { %v559_v2 = vpop.f32.mrf.mxu0  ;;  %2095 = vst [vmem:[#allocation7] sm:$0xff] %v1999_v62  ;;  %2324 = vmatmul.msk.f32.gmra.mxu2 %vm394_vm0, %v355_v58  ;;  %v1627_v62 = vcvt.s32.f32 %v1435_v47  ;;  %v161_v29 = vunpack.c.h.bf16 %v57_v55 }
  0x99   :  { %v2000_v4 = vpack.c.bf16 %v1810_v0, %v1809_v63  ;;  %2372 = vmatmul.msk.f32.gmra.mxu3 %vm394_vm0, %v355_v58  ;;  %v1187_v5 = vadd.f32 %v559_v2, %v150_v52  ;;  %v720_v9 = vpop.f32.mrf.mxu1  ;;  %v2704_v63 = vld [vmem:[%s3306_s3 + $0x20] sm:$0xff]  ;;  %v160_v0 = vunpack.c.l.bf16 %v57_v55  ;;  %v1628_v2 = vcvt.s32.f32 %v1436_v54  ;;  %v359_v54 = vld [vmem:[%s3304_s1 + $0xa8] sm:$0xff] }
  0x9a   :  { %v1188_v12 = vadd.f32 %v720_v9, %v151_v59  ;;  %v1443_v41 = vunpack.c.1.s8 %v2704_v63 }
  0x9b   :  { %2096 = vst [vmem:[#allocation7 + $0x8] sm:$0xff] %v2000_v4  ;;  %v1811_v11 = vmul.f32 %v1619_v1, %v1187_v5  ;;  %2228 = vmatmul.msk.f32.gmra.mxu0 %vm394_vm0, %v355_v58  ;;  %v881_v15 = vpop.f32.mrf.mxu2  ;;  %v1439_v5 = vunpack.c.0.s8 %v2704_v63 }
  0x9c   :  { %v1042_v16 = vpop.f32.mrf.mxu3  ;;  %v1812_v18 = vmul.f32 %v1620_v6, %v1188_v12  ;;  %v1189_v19 = vadd.f32 %v881_v15, %v152_v3  ;;  %2276 = vmatmul.msk.f32.gmra.mxu1 %vm394_vm0, %v355_v58  ;;  %v1437_v58 = vunpack.c.3.s8 %v2654_v28  ;;  %v58_v3 = vld [vmem:[#allocation2 + $0x40] sm:$0xff]  ;;  %v2712_v6 = vld [vmem:[%s3306_s3 + $0x28] sm:$0xff]  ;;  %v2723_v15 = vld [vmem:[%s3306_s3 + $0x38] sm:$0xff]  ;;  %v1635_v55 = vcvt.s32.f32 %v1443_v41 }
  0x9d   :  { %v1190_v20 = vadd.f32 %v1042_v16, %v153_v7  ;;  %v162_v14 = vunpack.c.l.bf16 %v58_v3  ;;  %v1631_v22 = vcvt.s32.f32 %v1439_v5 }
  0x9e   :  { %v2001_v31 = vpack.c.bf16 %v1812_v18, %v1811_v11  ;;  %v1813_v32 = vmul.f32 %v1621_v10, %v1189_v19  ;;  %v1629_v9 = vcvt.s32.f32 %v1437_v58  ;;  %v1630_v10 = vcvt.s32.f32 %v1438_v24  ;;  %v2718_v11 = vld [vmem:[%s3306_s3 + $0x30] sm:$0xff] }
  0x9f   :  { %v1814_v33 = vmul.f32 %v1622_v13, %v1190_v20  ;;  %v1440_v19 = vunpack.c.0.s8 %v2712_v6  ;;  %v59_v20 = vld [vmem:[#allocation2 + $0x48] sm:$0xff] }
  0xa0   :  { %v562_v35 = vpop.f32.mrf.mxu0  ;;  %2097 = vst [vmem:[#allocation7 + $0x10] sm:$0xff] %v2001_v31  ;;  %2325 = vmatmul.msk.f32.gmra.mxu2 %vm394_vm0, %v356_v23 }
  0xa1   :  { %v2002_v37 = vpack.c.bf16 %v1814_v33, %v1813_v32  ;;  %2373 = vmatmul.msk.f32.gmra.mxu3 %vm394_vm0, %v356_v23  ;;  %v1191_v38 = vadd.f32 %v562_v35, %v154_v17  ;;  %v723_v42 = vpop.f32.mrf.mxu1  ;;  %v1442_v32 = vunpack.c.0.s8 %v2723_v15 }
  0xa2   :  { %v1192_v45 = vadd.f32 %v723_v42, %v155_v25  ;;  %v1441_v25 = vunpack.c.0.s8 %v2718_v11 }
  0xa3   :  { %2098 = vst [vmem:[#allocation7 + $0x18] sm:$0xff] %v2002_v37  ;;  %v1815_v44 = vmul.f32 %v1623_v34, %v1191_v38  ;;  %2229 = vmatmul.msk.f32.gmra.mxu0 %vm394_vm0, %v356_v23  ;;  %v884_v48 = vpop.f32.mrf.mxu2  ;;  %v164_v34 = vunpack.c.l.bf16 %v59_v20  ;;  %v1632_v37 = vcvt.s32.f32 %v1440_v19  ;;  %v165_v38 = vunpack.c.h.bf16 %v59_v20  ;;  %v360_v19 = vld [vmem:[%s3304_s1 + $0xb0] sm:$0xff] }
  0xa4   :  { %v1045_v49 = vpop.f32.mrf.mxu3  ;;  %v1816_v51 = vmul.f32 %v1624_v39, %v1192_v45  ;;  %v1193_v52 = vadd.f32 %v884_v48, %v156_v36  ;;  %2277 = vmatmul.msk.f32.gmra.mxu1 %vm394_vm0, %v356_v23  ;;  %v163_v23 = vunpack.c.h.bf16 %v58_v3  ;;  %v60_v39 = vld [vmem:[#allocation2 + $0x50] sm:$0xff]  ;;  %v1634_v45 = vcvt.s32.f32 %v1442_v32 }
  0xa5   :  { %v1194_v53 = vadd.f32 %v1045_v49, %v157_v40  ;;  %v166_v48 = vunpack.c.l.bf16 %v60_v39  ;;  %v1447_v3 = vunpack.c.2.s8 %v2704_v63 }
  0xa6   :  { %v2003_v59 = vpack.c.bf16 %v1816_v51, %v1815_v44  ;;  %v1817_v60 = vmul.f32 %v1625_v43, %v1193_v52  ;;  %v1633_v44 = vcvt.s32.f32 %v1441_v25  ;;  %v1444_v52 = vunpack.c.1.s8 %v2712_v6 }
  0xa7   :  { %v1818_v61 = vmul.f32 %v1626_v46, %v1194_v53  ;;  %v61_v53 = vld [vmem:[#allocation2 + $0x58] sm:$0xff]  ;;  %v1639_v20 = vcvt.s32.f32 %v1447_v3 }
  0xa8   :  { %v565_v26 = vpop.f32.mrf.mxu0  ;;  %2099 = vst [vmem:[#allocation7 + $0x20] sm:$0xff] %v2003_v59  ;;  %2326 = vmatmul.msk.f32.gmra.mxu2 %vm394_vm0, %v357_v56 }
  0xa9   :  { %v2004_v1 = vpack.c.bf16 %v1818_v61, %v1817_v60  ;;  %2374 = vmatmul.msk.f32.gmra.mxu3 %vm394_vm0, %v357_v56  ;;  %v1195_v28 = vadd.f32 %v565_v26, %v158_v50  ;;  %v726_v4 = vpop.f32.mrf.mxu1  ;;  %v1446_v60 = vunpack.c.1.s8 %v2723_v15 }
  0xaa   :  { %v1196_v8 = vadd.f32 %v726_v4, %v159_v57  ;;  %v1445_v57 = vunpack.c.1.s8 %v2718_v11 }
  0xab   :  { %2100 = vst [vmem:[#allocation7 + $0x28] sm:$0xff] %v2004_v1  ;;  %v1819_v7 = vmul.f32 %v1627_v62, %v1195_v28  ;;  %2230 = vmatmul.msk.f32.gmra.mxu0 %vm394_vm0, %v357_v56  ;;  %v887_v12 = vpop.f32.mrf.mxu2  ;;  %v168_v62 = vunpack.c.l.bf16 %v61_v53  ;;  %v1636_v1 = vcvt.s32.f32 %v1444_v52  ;;  %v169_v28 = vunpack.c.h.bf16 %v61_v53 }
  0xac   :  { %v1048_v13 = vpop.f32.mrf.mxu3  ;;  %v1820_v16 = vmul.f32 %v1628_v2, %v1196_v8  ;;  %v1197_v17 = vadd.f32 %v887_v12, %v160_v0  ;;  %2278 = vmatmul.msk.f32.gmra.mxu1 %vm394_vm0, %v357_v56  ;;  %v167_v56 = vunpack.c.h.bf16 %v60_v39  ;;  %v62_v2 = vld [vmem:[#allocation2 + $0x60] sm:$0xff]  ;;  %v1638_v8 = vcvt.s32.f32 %v1446_v60 }
  0xad   :  { %v1198_v18 = vadd.f32 %v1048_v13, %v161_v29  ;;  %v170_v12 = vunpack.c.l.bf16 %v62_v2  ;;  %v1451_v39 = vunpack.c.3.s8 %v2704_v63  ;;  %v361_v63 = vld [vmem:[%s3304_s1 + $0xb8] sm:$0xff] }
  0xae   :  { %v2005_v27 = vpack.c.bf16 %v1820_v16, %v1819_v7  ;;  %v1821_v30 = vmul.f32 %v1629_v9, %v1197_v17  ;;  %v1637_v7 = vcvt.s32.f32 %v1445_v57  ;;  %v1448_v17 = vunpack.c.2.s8 %v2712_v6 }
  0xaf   :  { %v1822_v31 = vmul.f32 %v1630_v10, %v1198_v18  ;;  %v63_v18 = vld [vmem:[#allocation2 + $0x68] sm:$0xff]  ;;  %v1643_v52 = vcvt.s32.f32 %v1451_v39 }
  0xb0   :  { %v568_v33 = vpop.f32.mrf.mxu0  ;;  %2101 = vst [vmem:[#allocation7 + $0x30] sm:$0xff] %v2005_v27  ;;  %2327 = vmatmul.msk.f32.gmra.mxu2 %vm394_vm0, %v358_v21  ;;  %v172_v32 = vunpack.c.l.bf16 %v63_v18 }
  0xb1   :  { %v2006_v35 = vpack.c.bf16 %v1822_v31, %v1821_v30  ;;  %2375 = vmatmul.msk.f32.gmra.mxu3 %vm394_vm0, %v358_v21  ;;  %v1199_v36 = vadd.f32 %v568_v33, %v162_v14  ;;  %v729_v40 = vpop.f32.mrf.mxu1  ;;  %v1450_v30 = vunpack.c.2.s8 %v2723_v15 }
  0xb2   :  { %v1200_v43 = vadd.f32 %v729_v40, %v163_v23 }
  0xb3   :  { %2102 = vst [vmem:[#allocation7 + $0x38] sm:$0xff] %v2006_v35  ;;  %v1823_v42 = vmul.f32 %v1631_v22, %v1199_v36  ;;  %2231 = vmatmul.msk.f32.gmra.mxu0 %vm394_vm0, %v358_v21  ;;  %v890_v46 = vpop.f32.mrf.mxu2  ;;  %v1449_v22 = vunpack.c.2.s8 %v2718_v11  ;;  %v1640_v35 = vcvt.s32.f32 %v1448_v17  ;;  %v173_v36 = vunpack.c.h.bf16 %v63_v18  ;;  %v362_v17 = vld [vmem:[%s3304_s1 + $0xc0] sm:$0xff] }
  0xb4   :  { %v1051_v47 = vpop.f32.mrf.mxu3  ;;  %v1824_v49 = vmul.f32 %v1632_v37, %v1200_v43  ;;  %v1201_v50 = vadd.f32 %v890_v46, %v164_v34  ;;  %2279 = vmatmul.msk.f32.gmra.mxu1 %vm394_vm0, %v358_v21  ;;  %v171_v21 = vunpack.c.h.bf16 %v62_v2  ;;  %v64_v37 = vld [vmem:[#allocation2 + $0x70] sm:$0xff]  ;;  %v1642_v43 = vcvt.s32.f32 %v1450_v30 }
  0xb5   :  { %v1202_v51 = vadd.f32 %v1051_v47, %v165_v38  ;;  %v174_v46 = vunpack.c.l.bf16 %v64_v37  ;;  %v175_v53 = vunpack.c.h.bf16 %v64_v37 }
  0xb6   :  { %v2007_v58 = vpack.c.bf16 %v1824_v49, %v1823_v42  ;;  %v1825_v24 = vmul.f32 %v1633_v44, %v1201_v50  ;;  %v1641_v42 = vcvt.s32.f32 %v1449_v22  ;;  %v1452_v50 = vunpack.c.3.s8 %v2712_v6 }
  0xb7   :  { %v1826_v59 = vmul.f32 %v1634_v45, %v1202_v51  ;;  %v65_v51 = vld [vmem:[#allocation2 + $0x78] sm:$0xff] }
  0xb8   :  { %v571_v61 = vpop.f32.mrf.mxu0  ;;  %2103 = vst [vmem:[#allocation7 + $0x40] sm:$0xff] %v2007_v58  ;;  %2328 = vmatmul.msk.f32.gmra.mxu2 %vm394_vm0, %v359_v54  ;;  %v1454_v58 = vunpack.c.3.s8 %v2723_v15 }
  0xb9   :  { %v2008_v26 = vpack.c.bf16 %v1826_v59, %v1825_v24  ;;  %2376 = vmatmul.msk.f32.gmra.mxu3 %vm394_vm0, %v359_v54  ;;  %v1203_v0 = vadd.f32 %v571_v61, %v166_v48  ;;  %v732_v29 = vpop.f32.mrf.mxu1  ;;  %v2768_v24 = vld [vmem:[%s3306_s3 + $0x40] sm:$0xff]  ;;  %v176_v59 = vunpack.c.l.bf16 %v65_v51 }
  0xba   :  { %v1204_v5 = vadd.f32 %v732_v29, %v167_v56  ;;  %v1455_v15 = vunpack.c.0.s8 %v2768_v24  ;;  %v1646_v3 = vcvt.s32.f32 %v1454_v58  ;;  %v1459_v37 = vunpack.c.1.s8 %v2768_v24 }
  0xbb   :  { %2104 = vst [vmem:[#allocation7 + $0x48] sm:$0xff] %v2008_v26  ;;  %v1827_v4 = vmul.f32 %v1635_v55, %v1203_v0  ;;  %2232 = vmatmul.msk.f32.gmra.mxu0 %vm394_vm0, %v359_v54  ;;  %v893_v9 = vpop.f32.mrf.mxu2  ;;  %v66_v26 = vld [vmem:[#allocation2 + $0x80] sm:$0xff] }
  0xbc   :  { %v1054_v10 = vpop.f32.mrf.mxu3  ;;  %v1828_v13 = vmul.f32 %v1636_v1, %v1204_v5  ;;  %v1205_v14 = vadd.f32 %v893_v9, %v168_v62  ;;  %2280 = vmatmul.msk.f32.gmra.mxu1 %vm394_vm0, %v359_v54  ;;  %v1453_v54 = vunpack.c.3.s8 %v2718_v11  ;;  %v1644_v11 = vcvt.s32.f32 %v1452_v50  ;;  %v2776_v1 = vld [vmem:[%s3306_s3 + $0x48] sm:$0xff]  ;;  %v2787_v9 = vld [vmem:[%s3306_s3 + $0x58] sm:$0xff] }
  0xbd   :  { %v1206_v16 = vadd.f32 %v1054_v10, %v169_v28  ;;  %v177_v62 = vunpack.c.h.bf16 %v65_v51  ;;  %v1647_v18 = vcvt.s32.f32 %v1455_v15  ;;  %v363_v50 = vld [vmem:[%s3304_s1 + $0xc8] sm:$0xff]  ;;  %v1651_v51 = vcvt.s32.f32 %v1459_v37 }
  0xbe   :  { %v2009_v23 = vpack.c.bf16 %v1828_v13, %v1827_v4  ;;  %v1829_v25 = vmul.f32 %v1637_v7, %v1205_v14  ;;  %v1645_v29 = vcvt.s32.f32 %v1453_v54  ;;  %v2782_v4 = vld [vmem:[%s3306_s3 + $0x50] sm:$0xff]  ;;  %v1456_v14 = vunpack.c.0.s8 %v2776_v1 }
  0xbf   :  { %v1830_v27 = vmul.f32 %v1638_v8, %v1206_v16  ;;  %v178_v8 = vunpack.c.l.bf16 %v66_v26  ;;  %v67_v16 = vld [vmem:[#allocation2 + $0x88] sm:$0xff] }
  0xc0   :  { %v574_v31 = vpop.f32.mrf.mxu0  ;;  %2105 = vst [vmem:[#allocation7 + $0x50] sm:$0xff] %v2009_v23  ;;  %2329 = vmatmul.msk.f32.gmra.mxu2 %vm394_vm0, %v360_v19  ;;  %v180_v30 = vunpack.c.l.bf16 %v67_v16 }
  0xc1   :  { %v2010_v33 = vpack.c.bf16 %v1830_v27, %v1829_v25  ;;  %2377 = vmatmul.msk.f32.gmra.mxu3 %vm394_vm0, %v360_v19  ;;  %v1207_v34 = vadd.f32 %v574_v31, %v170_v12  ;;  %v735_v38 = vpop.f32.mrf.mxu1  ;;  %v1458_v25 = vunpack.c.0.s8 %v2787_v9 }
  0xc2   :  { %v1208_v41 = vadd.f32 %v735_v38, %v171_v21 }
  0xc3   :  { %2106 = vst [vmem:[#allocation7 + $0x58] sm:$0xff] %v2010_v33  ;;  %v1831_v40 = vmul.f32 %v1639_v20, %v1207_v34  ;;  %2233 = vmatmul.msk.f32.gmra.mxu0 %vm394_vm0, %v360_v19  ;;  %v896_v44 = vpop.f32.mrf.mxu2  ;;  %v1457_v20 = vunpack.c.0.s8 %v2782_v4  ;;  %v1648_v33 = vcvt.s32.f32 %v1456_v14  ;;  %v181_v34 = vunpack.c.h.bf16 %v67_v16  ;;  %v364_v14 = vld [vmem:[%s3304_s1 + $0xd0] sm:$0xff] }
  0xc4   :  { %v1057_v45 = vpop.f32.mrf.mxu3  ;;  %v1832_v47 = vmul.f32 %v1640_v35, %v1208_v41  ;;  %v1209_v48 = vadd.f32 %v896_v44, %v172_v32  ;;  %2281 = vmatmul.msk.f32.gmra.mxu1 %vm394_vm0, %v360_v19  ;;  %v179_v19 = vunpack.c.h.bf16 %v66_v26  ;;  %v68_v35 = vld [vmem:[#allocation2 + $0x90] sm:$0xff]  ;;  %v1650_v41 = vcvt.s32.f32 %v1458_v25 }
  0xc5   :  { %v1210_v49 = vadd.f32 %v1057_v45, %v173_v36  ;;  %v182_v44 = vunpack.c.l.bf16 %v68_v35  ;;  %v1463_v26 = vunpack.c.2.s8 %v2768_v24 }
  0xc6   :  { %v2011_v55 = vpack.c.bf16 %v1832_v47, %v1831_v40  ;;  %v1833_v56 = vmul.f32 %v1641_v42, %v1209_v48  ;;  %v1649_v40 = vcvt.s32.f32 %v1457_v20  ;;  %v1460_v48 = vunpack.c.1.s8 %v2776_v1 }
  0xc7   :  { %v1834_v57 = vmul.f32 %v1642_v43, %v1210_v49  ;;  %v69_v49 = vld [vmem:[#allocation2 + $0x98] sm:$0xff]  ;;  %v1655_v16 = vcvt.s32.f32 %v1463_v26 }
  0xc8   :  { %v577_v6 = vpop.f32.mrf.mxu0  ;;  %2107 = vst [vmem:[#allocation7 + $0x60] sm:$0xff] %v2011_v55  ;;  %2330 = vmatmul.msk.f32.gmra.mxu2 %vm394_vm0, %v361_v63  ;;  %v184_v58 = vunpack.c.l.bf16 %v69_v49 }
  0xc9   :  { %v2012_v60 = vpack.c.bf16 %v1834_v57, %v1833_v56  ;;  %2378 = vmatmul.msk.f32.gmra.mxu3 %vm394_vm0, %v361_v63  ;;  %v1211_v61 = vadd.f32 %v577_v6, %v174_v46  ;;  %v738_v0 = vpop.f32.mrf.mxu1  ;;  %v1462_v56 = vunpack.c.1.s8 %v2787_v9 }
  0xca   :  { %v1212_v2 = vadd.f32 %v738_v0, %v175_v53 }
  0xcb   :  { %2108 = vst [vmem:[#allocation7 + $0x68] sm:$0xff] %v2012_v60  ;;  %v1835_v28 = vmul.f32 %v1643_v52, %v1211_v61  ;;  %2234 = vmatmul.msk.f32.gmra.mxu0 %vm394_vm0, %v361_v63  ;;  %v899_v5 = vpop.f32.mrf.mxu2  ;;  %v1461_v52 = vunpack.c.1.s8 %v2782_v4  ;;  %v1652_v60 = vcvt.s32.f32 %v1460_v48  ;;  %v185_v61 = vunpack.c.h.bf16 %v69_v49 }
  0xcc   :  { %v1060_v7 = vpop.f32.mrf.mxu3  ;;  %v1836_v10 = vmul.f32 %v1644_v11, %v1212_v2  ;;  %v1213_v12 = vadd.f32 %v899_v5, %v176_v59  ;;  %2282 = vmatmul.msk.f32.gmra.mxu1 %vm394_vm0, %v361_v63  ;;  %v183_v63 = vunpack.c.h.bf16 %v68_v35  ;;  %v70_v11 = vld [vmem:[#allocation2 + $0xa0] sm:$0xff]  ;;  %v1654_v2 = vcvt.s32.f32 %v1462_v56 }
  0xcd   :  { %v1214_v13 = vadd.f32 %v1060_v7, %v177_v62  ;;  %v186_v5 = vunpack.c.l.bf16 %v70_v11  ;;  %v1467_v35 = vunpack.c.3.s8 %v2768_v24  ;;  %v365_v24 = vld [vmem:[%s3304_s1 + $0xd8] sm:$0xff] }
  0xce   :  { %v2013_v21 = vpack.c.bf16 %v1836_v10, %v1835_v28  ;;  %v1837_v22 = vmul.f32 %v1645_v29, %v1213_v12  ;;  %v1653_v28 = vcvt.s32.f32 %v1461_v52  ;;  %v1464_v12 = vunpack.c.2.s8 %v2776_v1 }
  0xcf   :  { %v1838_v23 = vmul.f32 %v1646_v3, %v1214_v13  ;;  %v71_v13 = vld [vmem:[#allocation2 + $0xa8] sm:$0xff]  ;;  %v1659_v48 = vcvt.s32.f32 %v1467_v35 }
  0xd0   :  { %v580_v27 = vpop.f32.mrf.mxu0  ;;  %2109 = vst [vmem:[#allocation7 + $0x70] sm:$0xff] %v2013_v21  ;;  %2331 = vmatmul.msk.f32.gmra.mxu2 %vm394_vm0, %v362_v17  ;;  %v188_v25 = vunpack.c.l.bf16 %v71_v13 }
  0xd1   :  { %v2014_v31 = vpack.c.bf16 %v1838_v23, %v1837_v22  ;;  %2379 = vmatmul.msk.f32.gmra.mxu3 %vm394_vm0, %v362_v17  ;;  %v1215_v32 = vadd.f32 %v580_v27, %v178_v8  ;;  %v741_v36 = vpop.f32.mrf.mxu1  ;;  %v1466_v22 = vunpack.c.2.s8 %v2787_v9 }
  0xd2   :  { %v1216_v39 = vadd.f32 %v741_v36, %v179_v19 }
  0xd3   :  { %2110 = vst [vmem:[#allocation7 + $0x78] sm:$0xff] %v2014_v31  ;;  %v1839_v38 = vmul.f32 %v1647_v18, %v1215_v32  ;;  %2235 = vmatmul.msk.f32.gmra.mxu0 %vm394_vm0, %v362_v17  ;;  %v902_v42 = vpop.f32.mrf.mxu2  ;;  %v1465_v18 = vunpack.c.2.s8 %v2782_v4  ;;  %v1656_v31 = vcvt.s32.f32 %v1464_v12  ;;  %v189_v32 = vunpack.c.h.bf16 %v71_v13  ;;  %v366_v12 = vld [vmem:[%s3304_s1 + $0xe0] sm:$0xff] }
  0xd4   :  { %v1063_v43 = vpop.f32.mrf.mxu3  ;;  %v1840_v45 = vmul.f32 %v1648_v33, %v1216_v39  ;;  %v1217_v46 = vadd.f32 %v902_v42, %v180_v30  ;;  %2283 = vmatmul.msk.f32.gmra.mxu1 %vm394_vm0, %v362_v17  ;;  %v187_v17 = vunpack.c.h.bf16 %v70_v11  ;;  %v72_v33 = vld [vmem:[#allocation2 + $0xb0] sm:$0xff]  ;;  %v1658_v39 = vcvt.s32.f32 %v1466_v22 }
  0xd5   :  { %v1218_v47 = vadd.f32 %v1063_v43, %v181_v34  ;;  %v190_v42 = vunpack.c.l.bf16 %v72_v33  ;;  %v191_v49 = vunpack.c.h.bf16 %v72_v33 }
  0xd6   :  { %v2015_v53 = vpack.c.bf16 %v1840_v45, %v1839_v38  ;;  %v1841_v54 = vmul.f32 %v1649_v40, %v1217_v46  ;;  %v1657_v38 = vcvt.s32.f32 %v1465_v18  ;;  %v1468_v46 = vunpack.c.3.s8 %v2776_v1 }
  0xd7   :  { %v1842_v55 = vmul.f32 %v1650_v41, %v1218_v47  ;;  %v73_v47 = vld [vmem:[#allocation2 + $0xb8] sm:$0xff] }
  0xd8   :  { %v583_v57 = vpop.f32.mrf.mxu0  ;;  %2111 = vst [vmem:[#allocation7 + $0x80] sm:$0xff] %v2015_v53  ;;  %2332 = vmatmul.msk.f32.gmra.mxu2 %vm394_vm0, %v363_v50  ;;  %v1470_v53 = vunpack.c.3.s8 %v2787_v9 }
  0xd9   :  { %v2016_v6 = vpack.c.bf16 %v1842_v55, %v1841_v54  ;;  %2380 = vmatmul.msk.f32.gmra.mxu3 %vm394_vm0, %v363_v50  ;;  %v1219_v59 = vadd.f32 %v583_v57, %v182_v44  ;;  %v744_v62 = vpop.f32.mrf.mxu1  ;;  %v2832_v54 = vld [vmem:[%s3306_s3 + $0x60] sm:$0xff]  ;;  %v192_v55 = vunpack.c.l.bf16 %v73_v47 }
  0xda   :  { %v1220_v15 = vadd.f32 %v744_v62, %v183_v63  ;;  %v1471_v9 = vunpack.c.0.s8 %v2832_v54  ;;  %v1662_v26 = vcvt.s32.f32 %v1470_v53  ;;  %v1475_v33 = vunpack.c.1.s8 %v2832_v54 }
  0xdb   :  { %2112 = vst [vmem:[#allocation7 + $0x88] sm:$0xff] %v2016_v6  ;;  %v1843_v0 = vmul.f32 %v1651_v51, %v1219_v59  ;;  %2236 = vmatmul.msk.f32.gmra.mxu0 %vm394_vm0, %v363_v50  ;;  %v905_v29 = vpop.f32.mrf.mxu2  ;;  %v74_v6 = vld [vmem:[#allocation2 + $0xc0] sm:$0xff] }
  0xdc   :  { %v1066_v3 = vpop.f32.mrf.mxu3  ;;  %v1844_v7 = vmul.f32 %v1652_v60, %v1220_v15  ;;  %v1221_v8 = vadd.f32 %v905_v29, %v184_v58  ;;  %2284 = vmatmul.msk.f32.gmra.mxu1 %vm394_vm0, %v363_v50  ;;  %v1469_v50 = vunpack.c.3.s8 %v2782_v4  ;;  %v1660_v4 = vcvt.s32.f32 %v1468_v46  ;;  %v2840_v60 = vld [vmem:[%s3306_s3 + $0x68] sm:$0xff]  ;;  %v2851_v29 = vld [vmem:[%s3306_s3 + $0x78] sm:$0xff] }
  0xdd   :  { %v1222_v10 = vadd.f32 %v1066_v3, %v185_v61  ;;  %v193_v58 = vunpack.c.h.bf16 %v73_v47  ;;  %v1663_v13 = vcvt.s32.f32 %v1471_v9  ;;  %v367_v46 = vld [vmem:[%s3304_s1 + $0xe8] sm:$0xff]  ;;  %v1667_v47 = vcvt.s32.f32 %v1475_v33 }
  0xde   :  { %v2017_v19 = vpack.c.bf16 %v1844_v7, %v1843_v0  ;;  %v1845_v20 = vmul.f32 %v1653_v28, %v1221_v8  ;;  %v1661_v62 = vcvt.s32.f32 %v1469_v50  ;;  %v2846_v0 = vld [vmem:[%s3306_s3 + $0x70] sm:$0xff]  ;;  %v1472_v8 = vunpack.c.0.s8 %v2840_v60 }
  0xdf   :  { %v1846_v21 = vmul.f32 %v1654_v2, %v1222_v10  ;;  %v194_v2 = vunpack.c.l.bf16 %v74_v6  ;;  %v75_v10 = vld [vmem:[#allocation2 + $0xc8] sm:$0xff] }
  0xe0   :  { %v586_v23 = vpop.f32.mrf.mxu0  ;;  %2113 = vst [vmem:[#allocation7 + $0x90] sm:$0xff] %v2017_v19  ;;  %2333 = vmatmul.msk.f32.gmra.mxu2 %vm394_vm0, %v364_v14  ;;  %v196_v22 = vunpack.c.l.bf16 %v75_v10 }
  0xe1   :  { %v2018_v27 = vpack.c.bf16 %v1846_v21, %v1845_v20  ;;  %2381 = vmatmul.msk.f32.gmra.mxu3 %vm394_vm0, %v364_v14  ;;  %v1223_v30 = vadd.f32 %v586_v23, %v186_v5  ;;  %v747_v34 = vpop.f32.mrf.mxu1  ;;  %v1474_v20 = vunpack.c.0.s8 %v2851_v29 }
  0xe2   :  { %v1224_v37 = vadd.f32 %v747_v34, %v187_v17 }
  0xe3   :  { %2114 = vst [vmem:[#allocation7 + $0x98] sm:$0xff] %v2018_v27  ;;  %v1847_v36 = vmul.f32 %v1655_v16, %v1223_v30  ;;  %2237 = vmatmul.msk.f32.gmra.mxu0 %vm394_vm0, %v364_v14  ;;  %v908_v40 = vpop.f32.mrf.mxu2  ;;  %v1473_v16 = vunpack.c.0.s8 %v2846_v0  ;;  %v1664_v27 = vcvt.s32.f32 %v1472_v8  ;;  %v197_v30 = vunpack.c.h.bf16 %v75_v10  ;;  %v368_v8 = vld [vmem:[%s3304_s1 + $0xf0] sm:$0xff] }
  0xe4   :  { %v1069_v41 = vpop.f32.mrf.mxu3  ;;  %v1848_v43 = vmul.f32 %v1656_v31, %v1224_v37  ;;  %v1225_v44 = vadd.f32 %v908_v40, %v188_v25  ;;  %2285 = vmatmul.msk.f32.gmra.mxu1 %vm394_vm0, %v364_v14  ;;  %v195_v14 = vunpack.c.h.bf16 %v74_v6  ;;  %v76_v31 = vld [vmem:[#allocation2 + $0xd0] sm:$0xff]  ;;  %v1666_v37 = vcvt.s32.f32 %v1474_v20 }
  0xe5   :  { %v1226_v45 = vadd.f32 %v1069_v41, %v189_v32  ;;  %v198_v40 = vunpack.c.l.bf16 %v76_v31  ;;  %v1479_v6 = vunpack.c.2.s8 %v2832_v54 }
  0xe6   :  { %v2019_v51 = vpack.c.bf16 %v1848_v43, %v1847_v36  ;;  %v1849_v63 = vmul.f32 %v1657_v38, %v1225_v44  ;;  %v1665_v36 = vcvt.s32.f32 %v1473_v16  ;;  %v1476_v44 = vunpack.c.1.s8 %v2840_v60 }
  0xe7   :  { %v1850_v52 = vmul.f32 %v1658_v39, %v1226_v45  ;;  %v77_v45 = vld [vmem:[#allocation2 + $0xd8] sm:$0xff]  ;;  %v1671_v10 = vcvt.s32.f32 %v1479_v6 }
  0xe8   :  { %v589_v1 = vpop.f32.mrf.mxu0  ;;  %2115 = vst [vmem:[#allocation7 + $0xa0] sm:$0xff] %v2019_v51  ;;  %2334 = vmatmul.msk.f32.gmra.mxu2 %vm394_vm0, %v365_v24  ;;  %v200_v53 = vunpack.c.l.bf16 %v77_v45 }
  0xe9   :  { %v2020_v56 = vpack.c.bf16 %v1850_v52, %v1849_v63  ;;  %2382 = vmatmul.msk.f32.gmra.mxu3 %vm394_vm0, %v365_v24  ;;  %v1227_v57 = vadd.f32 %v589_v1, %v190_v42  ;;  %v750_v59 = vpop.f32.mrf.mxu1  ;;  %v1478_v63 = vunpack.c.1.s8 %v2851_v29 }
  0xea   :  { %v1228_v11 = vadd.f32 %v750_v59, %v191_v49 }
  0xeb   :  { %2116 = vst [vmem:[#allocation7 + $0xa8] sm:$0xff] %v2020_v56  ;;  %v1851_v61 = vmul.f32 %v1659_v48, %v1227_v57  ;;  %2238 = vmatmul.msk.f32.gmra.mxu0 %vm394_vm0, %v365_v24  ;;  %v911_v15 = vpop.f32.mrf.mxu2  ;;  %v1477_v48 = vunpack.c.1.s8 %v2846_v0  ;;  %v1668_v56 = vcvt.s32.f32 %v1476_v44  ;;  %v201_v57 = vunpack.c.h.bf16 %v77_v45 }
  0xec   :  { %v1072_v28 = vpop.f32.mrf.mxu3  ;;  %v1852_v3 = vmul.f32 %v1660_v4, %v1228_v11  ;;  %v1229_v5 = vadd.f32 %v911_v15, %v192_v55  ;;  %2286 = vmatmul.msk.f32.gmra.mxu1 %vm394_vm0, %v365_v24  ;;  %v199_v24 = vunpack.c.h.bf16 %v76_v31  ;;  %v78_v4 = vld [vmem:[#allocation2 + $0xe0] sm:$0xff]  ;;  %v1670_v11 = vcvt.s32.f32 %v1478_v63 }
  0xed   :  { %v1230_v7 = vadd.f32 %v1072_v28, %v193_v58  ;;  %v202_v15 = vunpack.c.l.bf16 %v78_v4  ;;  %v1483_v31 = vunpack.c.3.s8 %v2832_v54  ;;  %v369_v54 = vld [vmem:[%s3304_s1 + $0xf8] sm:$0xff] }
  0xee   :  { %v2021_v17 = vpack.c.bf16 %v1852_v3, %v1851_v61  ;;  %v1853_v18 = vmul.f32 %v1661_v62, %v1229_v5  ;;  %v1669_v61 = vcvt.s32.f32 %v1477_v48  ;;  %v1480_v5 = vunpack.c.2.s8 %v2840_v60 }
  0xef   :  { %v1854_v19 = vmul.f32 %v1662_v26, %v1230_v7  ;;  %v79_v7 = vld [vmem:[#allocation2 + $0xe8] sm:$0xff]  ;;  %v1675_v44 = vcvt.s32.f32 %v1483_v31 }
  0xf0   :  { %v592_v21 = vpop.f32.mrf.mxu0  ;;  %2117 = vst [vmem:[#allocation7 + $0xb0] sm:$0xff] %v2021_v17  ;;  %2335 = vmatmul.msk.f32.gmra.mxu2 %vm394_vm0, %v366_v12  ;;  %v204_v20 = vunpack.c.l.bf16 %v79_v7 }
  0xf1   :  { %v2022_v23 = vpack.c.bf16 %v1854_v19, %v1853_v18  ;;  %2383 = vmatmul.msk.f32.gmra.mxu3 %vm394_vm0, %v366_v12  ;;  %v1231_v25 = vadd.f32 %v592_v21, %v194_v2  ;;  %v753_v32 = vpop.f32.mrf.mxu1  ;;  %v1482_v18 = vunpack.c.2.s8 %v2851_v29 }
  0xf2   :  { %v1232_v35 = vadd.f32 %v753_v32, %v195_v14 }
  0xf3   :  { %2118 = vst [vmem:[#allocation7 + $0xb8] sm:$0xff] %v2022_v23  ;;  %v1855_v34 = vmul.f32 %v1663_v13, %v1231_v25  ;;  %2239 = vmatmul.msk.f32.gmra.mxu0 %vm394_vm0, %v366_v12  ;;  %v914_v38 = vpop.f32.mrf.mxu2  ;;  %v1481_v13 = vunpack.c.2.s8 %v2846_v0  ;;  %v1672_v23 = vcvt.s32.f32 %v1480_v5  ;;  %v205_v25 = vunpack.c.h.bf16 %v79_v7  ;;  %v370_v5 = vld [vmem:[%s3304_s1 + $0x100] sm:$0xff] }
  0xf4   :  { %v1075_v39 = vpop.f32.mrf.mxu3  ;;  %v1856_v41 = vmul.f32 %v1664_v27, %v1232_v35  ;;  %v1233_v42 = vadd.f32 %v914_v38, %v196_v22  ;;  %2287 = vmatmul.msk.f32.gmra.mxu1 %vm394_vm0, %v366_v12  ;;  %v203_v12 = vunpack.c.h.bf16 %v78_v4  ;;  %v80_v27 = vld [vmem:[#allocation2 + $0xf0] sm:$0xff]  ;;  %v1674_v35 = vcvt.s32.f32 %v1482_v18 }
  0xf5   :  { %v1234_v43 = vadd.f32 %v1075_v39, %v197_v30  ;;  %v206_v38 = vunpack.c.l.bf16 %v80_v27  ;;  %v207_v45 = vunpack.c.h.bf16 %v80_v27 }
  0xf6   :  { %v2023_v49 = vpack.c.bf16 %v1856_v41, %v1855_v34  ;;  %v1857_v50 = vmul.f32 %v1665_v36, %v1233_v42  ;;  %v1673_v34 = vcvt.s32.f32 %v1481_v13  ;;  %v1484_v42 = vunpack.c.3.s8 %v2840_v60 }
  0xf7   :  { %v1858_v51 = vmul.f32 %v1666_v37, %v1234_v43  ;;  %v81_v43 = vld [vmem:[#allocation2 + $0xf8] sm:$0xff] }
  0xf8   :  { %v595_v52 = vpop.f32.mrf.mxu0  ;;  %2119 = vst [vmem:[#allocation7 + $0xc0] sm:$0xff] %v2023_v49  ;;  %2336 = vmatmul.msk.f32.gmra.mxu2 %vm394_vm0, %v367_v46  ;;  %v1486_v49 = vunpack.c.3.s8 %v2851_v29 }
  0xf9   :  { %v2024_v1 = vpack.c.bf16 %v1858_v51, %v1857_v50  ;;  %2384 = vmatmul.msk.f32.gmra.mxu3 %vm394_vm0, %v367_v46  ;;  %v1235_v55 = vadd.f32 %v595_v52, %v198_v40  ;;  %v756_v58 = vpop.f32.mrf.mxu1  ;;  %v2896_v50 = vld [vmem:[%s3306_s3 + $0x80] sm:$0xff]  ;;  %v208_v51 = vunpack.c.l.bf16 %v81_v43 }
  0xfa   :  { %v1236_v9 = vadd.f32 %v756_v58, %v199_v24  ;;  %v1487_v29 = vunpack.c.0.s8 %v2896_v50  ;;  %v1678_v6 = vcvt.s32.f32 %v1486_v49  ;;  %v1491_v27 = vunpack.c.1.s8 %v2896_v50 }
  0xfb   :  { %2120 = vst [vmem:[#allocation7 + $0xc8] sm:$0xff] %v2024_v1  ;;  %v1859_v59 = vmul.f32 %v1667_v47, %v1235_v55  ;;  %2240 = vmatmul.msk.f32.gmra.mxu0 %vm394_vm0, %v367_v46  ;;  %v917_v62 = vpop.f32.mrf.mxu2  ;;  %v82_v1 = vld [vmem:[#allocation2 + $0x100] sm:$0xff] }
  0xfc   :  { %v1078_v26 = vpop.f32.mrf.mxu3  ;;  %v1860_v28 = vmul.f32 %v1668_v56, %v1236_v9  ;;  %v1237_v2 = vadd.f32 %v917_v62, %v200_v53  ;;  %2288 = vmatmul.msk.f32.gmra.mxu1 %vm394_vm0, %v367_v46  ;;  %v1485_v46 = vunpack.c.3.s8 %v2846_v0  ;;  %v1676_v0 = vcvt.s32.f32 %v1484_v42  ;;  %v2904_v56 = vld [vmem:[%s3306_s3 + $0x88] sm:$0xff]  ;;  %v2915_v62 = vld [vmem:[%s3306_s3 + $0x98] sm:$0xff] }
  0xfd   :  { %v1238_v3 = vadd.f32 %v1078_v26, %v201_v57  ;;  %v209_v53 = vunpack.c.h.bf16 %v81_v43  ;;  %v1679_v7 = vcvt.s32.f32 %v1487_v29  ;;  %v371_v42 = vld [vmem:[%s3304_s1 + $0x108] sm:$0xff]  ;;  %v1683_v43 = vcvt.s32.f32 %v1491_v27 }
  0xfe   :  { %v2025_v14 = vpack.c.bf16 %v1860_v28, %v1859_v59  ;;  %v1861_v16 = vmul.f32 %v1669_v61, %v1237_v2  ;;  %v1677_v58 = vcvt.s32.f32 %v1485_v46  ;;  %v2910_v59 = vld [vmem:[%s3306_s3 + $0x90] sm:$0xff]  ;;  %v1488_v2 = vunpack.c.0.s8 %v2904_v56 }
  0xff   :  { %v1862_v17 = vmul.f32 %v1670_v11, %v1238_v3  ;;  %v210_v11 = vunpack.c.l.bf16 %v82_v1  ;;  %v83_v3 = vld [vmem:[#allocation2 + $0x108] sm:$0xff] }
 0x100   :  { %v598_v19 = vpop.f32.mrf.mxu0  ;;  %2121 = vst [vmem:[#allocation7 + $0xd0] sm:$0xff] %v2025_v14  ;;  %2337 = vmatmul.msk.f32.gmra.mxu2 %vm394_vm0, %v368_v8  ;;  %v212_v18 = vunpack.c.l.bf16 %v83_v3 }
 0x101   :  { %v2026_v21 = vpack.c.bf16 %v1862_v17, %v1861_v16  ;;  %2385 = vmatmul.msk.f32.gmra.mxu3 %vm394_vm0, %v368_v8  ;;  %v1239_v22 = vadd.f32 %v598_v19, %v202_v15  ;;  %v759_v30 = vpop.f32.mrf.mxu1  ;;  %v1490_v16 = vunpack.c.0.s8 %v2915_v62 }
 0x102   :  { %v1240_v33 = vadd.f32 %v759_v30, %v203_v12 }
 0x103   :  { %2122 = vst [vmem:[#allocation7 + $0xd8] sm:$0xff] %v2026_v21  ;;  %v1863_v32 = vmul.f32 %v1671_v10, %v1239_v22  ;;  %2241 = vmatmul.msk.f32.gmra.mxu0 %vm394_vm0, %v368_v8  ;;  %v920_v36 = vpop.f32.mrf.mxu2  ;;  %v1489_v10 = vunpack.c.0.s8 %v2910_v59  ;;  %v1680_v21 = vcvt.s32.f32 %v1488_v2  ;;  %v213_v22 = vunpack.c.h.bf16 %v83_v3  ;;  %v372_v2 = vld [vmem:[%s3304_s1 + $0x110] sm:$0xff] }
 0x104   :  { %v1081_v37 = vpop.f32.mrf.mxu3  ;;  %v1864_v39 = vmul.f32 %v1672_v23, %v1240_v33  ;;  %v1241_v40 = vadd.f32 %v920_v36, %v204_v20  ;;  %2289 = vmatmul.msk.f32.gmra.mxu1 %vm394_vm0, %v368_v8  ;;  %v211_v8 = vunpack.c.h.bf16 %v82_v1  ;;  %v84_v23 = vld [vmem:[#allocation2 + $0x110] sm:$0xff]  ;;  %v1682_v33 = vcvt.s32.f32 %v1490_v16 }
 0x105   :  { %v1242_v41 = vadd.f32 %v1081_v37, %v205_v25  ;;  %v214_v36 = vunpack.c.l.bf16 %v84_v23  ;;  %v1495_v1 = vunpack.c.2.s8 %v2896_v50 }
 0x106   :  { %v2027_v47 = vpack.c.bf16 %v1864_v39, %v1863_v32  ;;  %v1865_v24 = vmul.f32 %v1673_v34, %v1241_v40  ;;  %v1681_v32 = vcvt.s32.f32 %v1489_v10  ;;  %v1492_v40 = vunpack.c.1.s8 %v2904_v56 }
 0x107   :  { %v1866_v48 = vmul.f32 %v1674_v35, %v1242_v41  ;;  %v85_v41 = vld [vmem:[#allocation2 + $0x118] sm:$0xff]  ;;  %v1687_v3 = vcvt.s32.f32 %v1495_v1 }
 0x108   :  { %v601_v60 = vpop.f32.mrf.mxu0  ;;  %2123 = vst [vmem:[#allocation7 + $0xe0] sm:$0xff] %v2027_v47  ;;  %2338 = vmatmul.msk.f32.gmra.mxu2 %vm394_vm0, %v369_v54  ;;  %v216_v49 = vunpack.c.l.bf16 %v85_v41 }
 0x109   :  { %v2028_v63 = vpack.c.bf16 %v1866_v48, %v1865_v24  ;;  %2386 = vmatmul.msk.f32.gmra.mxu3 %vm394_vm0, %v369_v54  ;;  %v1243_v52 = vadd.f32 %v601_v60, %v206_v38  ;;  %v762_v55 = vpop.f32.mrf.mxu1  ;;  %v1494_v24 = vunpack.c.1.s8 %v2915_v62 }
 0x10a   :  { %v1244_v4 = vadd.f32 %v762_v55, %v207_v45 }
 0x10b   :  { %2124 = vst [vmem:[#allocation7 + $0xe8] sm:$0xff] %v2028_v63  ;;  %v1867_v57 = vmul.f32 %v1675_v44, %v1243_v52  ;;  %2242 = vmatmul.msk.f32.gmra.mxu0 %vm394_vm0, %v369_v54  ;;  %v923_v9 = vpop.f32.mrf.mxu2  ;;  %v1493_v44 = vunpack.c.1.s8 %v2910_v59  ;;  %v1684_v63 = vcvt.s32.f32 %v1492_v40  ;;  %v217_v52 = vunpack.c.h.bf16 %v85_v41 }
 0x10c   :  { %v1084_v61 = vpop.f32.mrf.mxu3  ;;  %v1868_v26 = vmul.f32 %v1676_v0, %v1244_v4  ;;  %v1245_v15 = vadd.f32 %v923_v9, %v208_v51  ;;  %2290 = vmatmul.msk.f32.gmra.mxu1 %vm394_vm0, %v369_v54  ;;  %v215_v54 = vunpack.c.h.bf16 %v84_v23  ;;  %v86_v0 = vld [vmem:[#allocation2 + $0x120] sm:$0xff]  ;;  %v1686_v4 = vcvt.s32.f32 %v1494_v24 }
 0x10d   :  { %v1246_v28 = vadd.f32 %v1084_v61, %v209_v53  ;;  %v218_v9 = vunpack.c.l.bf16 %v86_v0  ;;  %v1499_v23 = vunpack.c.3.s8 %v2896_v50  ;;  %v373_v50 = vld [vmem:[%s3304_s1 + $0x118] sm:$0xff] }
 0x10e   :  { %v2029_v12 = vpack.c.bf16 %v1868_v26, %v1867_v57  ;;  %v1869_v13 = vmul.f32 %v1677_v58, %v1245_v15  ;;  %v1685_v57 = vcvt.s32.f32 %v1493_v44  ;;  %v1496_v15 = vunpack.c.2.s8 %v2904_v56 }
 0x10f   :  { %v1870_v14 = vmul.f32 %v1678_v6, %v1246_v28  ;;  %v87_v28 = vld [vmem:[#allocation2 + $0x128] sm:$0xff]  ;;  %v1691_v40 = vcvt.s32.f32 %v1499_v23 }
 0x110   :  { %v604_v17 = vpop.f32.mrf.mxu0  ;;  %2125 = vst [vmem:[#allocation7 + $0xf0] sm:$0xff] %v2029_v12  ;;  %2339 = vmatmul.msk.f32.gmra.mxu2 %vm394_vm0, %v370_v5  ;;  %v220_v16 = vunpack.c.l.bf16 %v87_v28 }
 0x111   :  { %v2030_v19 = vpack.c.bf16 %v1870_v14, %v1869_v13  ;;  %2387 = vmatmul.msk.f32.gmra.mxu3 %vm394_vm0, %v370_v5  ;;  %v1247_v20 = vadd.f32 %v604_v17, %v210_v11  ;;  %v765_v25 = vpop.f32.mrf.mxu1  ;;  %v1498_v13 = vunpack.c.2.s8 %v2915_v62 }
 0x112   :  { %v1248_v31 = vadd.f32 %v765_v25, %v211_v8 }
 0x113   :  { %2126 = vst [vmem:[#allocation7 + $0xf8] sm:$0xff] %v2030_v19  ;;  %v1871_v30 = vmul.f32 %v1679_v7, %v1247_v20  ;;  %2243 = vmatmul.msk.f32.gmra.mxu0 %vm394_vm0, %v370_v5  ;;  %v926_v34 = vpop.f32.mrf.mxu2  ;;  %v1497_v7 = vunpack.c.2.s8 %v2910_v59  ;;  %v1688_v19 = vcvt.s32.f32 %v1496_v15  ;;  %v221_v20 = vunpack.c.h.bf16 %v87_v28  ;;  %v374_v15 = vld [vmem:[%s3304_s1 + $0x120] sm:$0xff] }
 0x114   :  { %v1087_v35 = vpop.f32.mrf.mxu3  ;;  %v1872_v37 = vmul.f32 %v1680_v21, %v1248_v31  ;;  %v1249_v38 = vadd.f32 %v926_v34, %v212_v18  ;;  %2291 = vmatmul.msk.f32.gmra.mxu1 %vm394_vm0, %v370_v5  ;;  %v219_v5 = vunpack.c.h.bf16 %v86_v0  ;;  %v88_v21 = vld [vmem:[#allocation2 + $0x130] sm:$0xff]  ;;  %v1690_v31 = vcvt.s32.f32 %v1498_v13 }
 0x115   :  { %v1250_v39 = vadd.f32 %v1087_v35, %v213_v22  ;;  %v222_v34 = vunpack.c.l.bf16 %v88_v21  ;;  %v223_v41 = vunpack.c.h.bf16 %v88_v21 }
 0x116   :  { %v2031_v45 = vpack.c.bf16 %v1872_v37, %v1871_v30  ;;  %v1873_v46 = vmul.f32 %v1681_v32, %v1249_v38  ;;  %v1689_v30 = vcvt.s32.f32 %v1497_v7  ;;  %v1500_v38 = vunpack.c.3.s8 %v2904_v56 }
 0x117   :  { %v1874_v47 = vmul.f32 %v1682_v33, %v1250_v39  ;;  %v89_v39 = vld [vmem:[#allocation2 + $0x138] sm:$0xff] }
 0x118   :  { %v607_v48 = vpop.f32.mrf.mxu0  ;;  %2127 = vst [vmem:[#allocation7 + $0x100] sm:$0xff] %v2031_v45  ;;  %2340 = vmatmul.msk.f32.gmra.mxu2 %vm394_vm0, %v371_v42  ;;  %v1502_v45 = vunpack.c.3.s8 %v2915_v62 }
 0x119   :  { %v2032_v60 = vpack.c.bf16 %v1874_v47, %v1873_v46  ;;  %2388 = vmatmul.msk.f32.gmra.mxu3 %vm394_vm0, %v371_v42  ;;  %v1251_v51 = vadd.f32 %v607_v48, %v214_v36  ;;  %v768_v53 = vpop.f32.mrf.mxu1  ;;  %v2960_v46 = vld [vmem:[%s3306_s3 + $0xa0] sm:$0xff]  ;;  %v224_v47 = vunpack.c.l.bf16 %v89_v39 }
 0x11a   :  { %v1252_v29 = vadd.f32 %v768_v53, %v215_v54  ;;  %v1503_v62 = vunpack.c.0.s8 %v2960_v46  ;;  %v1694_v1 = vcvt.s32.f32 %v1502_v45  ;;  %v1507_v21 = vunpack.c.1.s8 %v2960_v46 }
 0x11b   :  { %2128 = vst [vmem:[#allocation7 + $0x108] sm:$0xff] %v2032_v60  ;;  %v1875_v55 = vmul.f32 %v1683_v43, %v1251_v51  ;;  %2244 = vmatmul.msk.f32.gmra.mxu0 %vm394_vm0, %v371_v42  ;;  %v929_v58 = vpop.f32.mrf.mxu2  ;;  %v90_v60 = vld [vmem:[#allocation2 + $0x140] sm:$0xff] }
 0x11c   :  { %v1090_v6 = vpop.f32.mrf.mxu3  ;;  %v1876_v61 = vmul.f32 %v1684_v63, %v1252_v29  ;;  %v1253_v11 = vadd.f32 %v929_v58, %v216_v49  ;;  %2292 = vmatmul.msk.f32.gmra.mxu1 %vm394_vm0, %v371_v42  ;;  %v1501_v42 = vunpack.c.3.s8 %v2910_v59  ;;  %v1692_v59 = vcvt.s32.f32 %v1500_v38  ;;  %v2968_v63 = vld [vmem:[%s3306_s3 + $0xa8] sm:$0xff]  ;;  %v2979_v58 = vld [vmem:[%s3306_s3 + $0xb8] sm:$0xff] }
 0x11d   :  { %v1254_v26 = vadd.f32 %v1090_v6, %v217_v52  ;;  %v225_v49 = vunpack.c.h.bf16 %v89_v39  ;;  %v1695_v28 = vcvt.s32.f32 %v1503_v62  ;;  %v375_v38 = vld [vmem:[%s3304_s1 + $0x128] sm:$0xff]  ;;  %v1699_v39 = vcvt.s32.f32 %v1507_v21 }
 0x11e   :  { %v2033_v8 = vpack.c.bf16 %v1876_v61, %v1875_v55  ;;  %v1877_v10 = vmul.f32 %v1685_v57, %v1253_v11  ;;  %v1693_v53 = vcvt.s32.f32 %v1501_v42  ;;  %v2974_v55 = vld [vmem:[%s3306_s3 + $0xb0] sm:$0xff]  ;;  %v1504_v11 = vunpack.c.0.s8 %v2968_v63 }
 0x11f   :  { %v1878_v12 = vmul.f32 %v1686_v4, %v1254_v26  ;;  %v226_v4 = vunpack.c.l.bf16 %v90_v60  ;;  %v91_v26 = vld [vmem:[#allocation2 + $0x148] sm:$0xff] }
 0x120   :  { %v610_v14 = vpop.f32.mrf.mxu0  ;;  %2129 = vst [vmem:[#allocation7 + $0x110] sm:$0xff] %v2033_v8  ;;  %2341 = vmatmul.msk.f32.gmra.mxu2 %vm394_vm0, %v372_v2  ;;  %v228_v13 = vunpack.c.l.bf16 %v91_v26 }
 0x121   :  { %v2034_v17 = vpack.c.bf16 %v1878_v12, %v1877_v10  ;;  %2389 = vmatmul.msk.f32.gmra.mxu3 %vm394_vm0, %v372_v2  ;;  %v1255_v18 = vadd.f32 %v610_v14, %v218_v9  ;;  %v771_v22 = vpop.f32.mrf.mxu1  ;;  %v1506_v10 = vunpack.c.0.s8 %v2979_v58 }
 0x122   :  { %v1256_v27 = vadd.f32 %v771_v22, %v219_v5 }
 0x123   :  { %2130 = vst [vmem:[#allocation7 + $0x118] sm:$0xff] %v2034_v17  ;;  %v1879_v25 = vmul.f32 %v1687_v3, %v1255_v18  ;;  %2245 = vmatmul.msk.f32.gmra.mxu0 %vm394_vm0, %v372_v2  ;;  %v932_v32 = vpop.f32.mrf.mxu2  ;;  %v1505_v3 = vunpack.c.0.s8 %v2974_v55  ;;  %v1696_v17 = vcvt.s32.f32 %v1504_v11  ;;  %v229_v18 = vunpack.c.h.bf16 %v91_v26  ;;  %v376_v11 = vld [vmem:[%s3304_s1 + $0x130] sm:$0xff] }
 0x124   :  { %v1093_v33 = vpop.f32.mrf.mxu3  ;;  %v1880_v35 = vmul.f32 %v1688_v19, %v1256_v27  ;;  %v1257_v36 = vadd.f32 %v932_v32, %v220_v16  ;;  %2293 = vmatmul.msk.f32.gmra.mxu1 %vm394_vm0, %v372_v2  ;;  %v227_v2 = vunpack.c.h.bf16 %v90_v60  ;;  %v92_v19 = vld [vmem:[#allocation2 + $0x150] sm:$0xff]  ;;  %v1698_v27 = vcvt.s32.f32 %v1506_v10 }
 0x125   :  { %v1258_v37 = vadd.f32 %v1093_v33, %v221_v20  ;;  %v230_v32 = vunpack.c.l.bf16 %v92_v19  ;;  %v1511_v60 = vunpack.c.2.s8 %v2960_v46 }
 0x126   :  { %v2035_v43 = vpack.c.bf16 %v1880_v35, %v1879_v25  ;;  %v1881_v54 = vmul.f32 %v1689_v30, %v1257_v36  ;;  %v1697_v25 = vcvt.s32.f32 %v1505_v3  ;;  %v1508_v36 = vunpack.c.1.s8 %v2968_v63 }
 0x127   :  { %v1882_v44 = vmul.f32 %v1690_v31, %v1258_v37  ;;  %v93_v37 = vld [vmem:[#allocation2 + $0x158] sm:$0xff]  ;;  %v1703_v26 = vcvt.s32.f32 %v1511_v60 }
 0x128   :  { %v613_v56 = vpop.f32.mrf.mxu0  ;;  %2131 = vst [vmem:[#allocation7 + $0x120] sm:$0xff] %v2035_v43  ;;  %2342 = vmatmul.msk.f32.gmra.mxu2 %vm394_vm0, %v373_v50  ;;  %v232_v45 = vunpack.c.l.bf16 %v93_v37 }
 0x129   :  { %v2036_v24 = vpack.c.bf16 %v1882_v44, %v1881_v54  ;;  %2390 = vmatmul.msk.f32.gmra.mxu3 %vm394_vm0, %v373_v50  ;;  %v1259_v48 = vadd.f32 %v613_v56, %v222_v34  ;;  %v774_v51 = vpop.f32.mrf.mxu1  ;;  %v1510_v54 = vunpack.c.1.s8 %v2979_v58 }
 0x12a   :  { %v1260_v0 = vadd.f32 %v774_v51, %v223_v41 }
 0x12b   :  { %2132 = vst [vmem:[#allocation7 + $0x128] sm:$0xff] %v2036_v24  ;;  %v1883_v52 = vmul.f32 %v1691_v40, %v1259_v48  ;;  %2246 = vmatmul.msk.f32.gmra.mxu0 %vm394_vm0, %v373_v50  ;;  %v935_v29 = vpop.f32.mrf.mxu2  ;;  %v1509_v40 = vunpack.c.1.s8 %v2974_v55  ;;  %v1700_v24 = vcvt.s32.f32 %v1508_v36  ;;  %v233_v48 = vunpack.c.h.bf16 %v93_v37 }
 0x12c   :  { %v1096_v57 = vpop.f32.mrf.mxu3  ;;  %v1884_v6 = vmul.f32 %v1692_v59, %v1260_v0  ;;  %v1261_v9 = vadd.f32 %v935_v29, %v224_v47  ;;  %2294 = vmatmul.msk.f32.gmra.mxu1 %vm394_vm0, %v373_v50  ;;  %v231_v50 = vunpack.c.h.bf16 %v92_v19  ;;  %v94_v59 = vld [vmem:[#allocation2 + $0x160] sm:$0xff]  ;;  %v1702_v0 = vcvt.s32.f32 %v1510_v54 }
 0x12d   :  { %v1262_v61 = vadd.f32 %v1096_v57, %v225_v49  ;;  %v234_v29 = vunpack.c.l.bf16 %v94_v59  ;;  %v1515_v19 = vunpack.c.3.s8 %v2960_v46  ;;  %v377_v46 = vld [vmem:[%s3304_s1 + $0x138] sm:$0xff] }
 0x12e   :  { %v2037_v5 = vpack.c.bf16 %v1884_v6, %v1883_v52  ;;  %v1885_v7 = vmul.f32 %v1693_v53, %v1261_v9  ;;  %v1701_v52 = vcvt.s32.f32 %v1509_v40  ;;  %v1512_v9 = vunpack.c.2.s8 %v2968_v63 }
 0x12f   :  { %v1886_v8 = vmul.f32 %v1694_v1, %v1262_v61  ;;  %v95_v61 = vld [vmem:[#allocation2 + $0x168] sm:$0xff]  ;;  %v1707_v36 = vcvt.s32.f32 %v1515_v19 }
 0x130   :  { %v616_v12 = vpop.f32.mrf.mxu0  ;;  %2133 = vst [vmem:[#allocation7 + $0x130] sm:$0xff] %v2037_v5  ;;  %2343 = vmatmul.msk.f32.gmra.mxu2 %vm394_vm0, %v374_v15  ;;  %v236_v10 = vunpack.c.l.bf16 %v95_v61 }
 0x131   :  { %v2038_v14 = vpack.c.bf16 %v1886_v8, %v1885_v7  ;;  %2391 = vmatmul.msk.f32.gmra.mxu3 %vm394_vm0, %v374_v15  ;;  %v1263_v16 = vadd.f32 %v616_v12, %v226_v4  ;;  %v777_v20 = vpop.f32.mrf.mxu1  ;;  %v1514_v7 = vunpack.c.2.s8 %v2979_v58 }
 0x132   :  { %v1264_v23 = vadd.f32 %v777_v20, %v227_v2 }
 0x133   :  { %2134 = vst [vmem:[#allocation7 + $0x138] sm:$0xff] %v2038_v14  ;;  %v1887_v22 = vmul.f32 %v1695_v28, %v1263_v16  ;;  %2247 = vmatmul.msk.f32.gmra.mxu0 %vm394_vm0, %v374_v15  ;;  %v938_v30 = vpop.f32.mrf.mxu2  ;;  %v1513_v28 = vunpack.c.2.s8 %v2974_v55  ;;  %v1704_v14 = vcvt.s32.f32 %v1512_v9  ;;  %v237_v16 = vunpack.c.h.bf16 %v95_v61  ;;  %v378_v9 = vld [vmem:[%s3304_s1 + $0x140] sm:$0xff] }
 0x134   :  { %v1099_v31 = vpop.f32.mrf.mxu3  ;;  %v1888_v33 = vmul.f32 %v1696_v17, %v1264_v23  ;;  %v1265_v34 = vadd.f32 %v938_v30, %v228_v13  ;;  %2295 = vmatmul.msk.f32.gmra.mxu1 %vm394_vm0, %v374_v15  ;;  %v235_v15 = vunpack.c.h.bf16 %v94_v59  ;;  %v96_v17 = vld [vmem:[#allocation2 + $0x170] sm:$0xff]  ;;  %v1706_v23 = vcvt.s32.f32 %v1514_v7 }
 0x135   :  { %v1266_v35 = vadd.f32 %v1099_v31, %v229_v18  ;;  %v238_v30 = vunpack.c.l.bf16 %v96_v17  ;;  %v239_v37 = vunpack.c.h.bf16 %v96_v17 }
 0x136   :  { %v2039_v41 = vpack.c.bf16 %v1888_v33, %v1887_v22  ;;  %v1889_v42 = vmul.f32 %v1697_v25, %v1265_v34  ;;  %v1705_v22 = vcvt.s32.f32 %v1513_v28  ;;  %v1516_v34 = vunpack.c.3.s8 %v2968_v63 }
 0x137   :  { %v1890_v43 = vmul.f32 %v1698_v27, %v1266_v35  ;;  %v97_v35 = vld [vmem:[#allocation2 + $0x178] sm:$0xff] }
 0x138   :  { %v619_v44 = vpop.f32.mrf.mxu0  ;;  %2135 = vst [vmem:[#allocation7 + $0x140] sm:$0xff] %v2039_v41  ;;  %2344 = vmatmul.msk.f32.gmra.mxu2 %vm394_vm0, %v375_v38  ;;  %v1518_v41 = vunpack.c.3.s8 %v2979_v58 }
 0x139   :  { %v2040_v56 = vpack.c.bf16 %v1890_v43, %v1889_v42  ;;  %2392 = vmatmul.msk.f32.gmra.mxu3 %vm394_vm0, %v375_v38  ;;  %v1267_v47 = vadd.f32 %v619_v44, %v230_v32  ;;  %v780_v49 = vpop.f32.mrf.mxu1  ;;  %v3024_v42 = vld [vmem:[%s3306_s3 + $0xc0] sm:$0xff]  ;;  %v240_v43 = vunpack.c.l.bf16 %v97_v35 }
 0x13a   :  { %v1268_v62 = vadd.f32 %v780_v49, %v231_v50  ;;  %v1519_v58 = vunpack.c.0.s8 %v3024_v42  ;;  %v1710_v60 = vcvt.s32.f32 %v1518_v41  ;;  %v1523_v17 = vunpack.c.1.s8 %v3024_v42 }
 0x13b   :  { %2136 = vst [vmem:[#allocation7 + $0x148] sm:$0xff] %v2040_v56  ;;  %v1891_v51 = vmul.f32 %v1699_v39, %v1267_v47  ;;  %2248 = vmatmul.msk.f32.gmra.mxu0 %vm394_vm0, %v375_v38  ;;  %v941_v53 = vpop.f32.mrf.mxu2  ;;  %v98_v56 = vld [vmem:[#allocation2 + $0x180] sm:$0xff] }
 0x13c   :  { %v1102_v1 = vpop.f32.mrf.mxu3  ;;  %v1892_v57 = vmul.f32 %v1700_v24, %v1268_v62  ;;  %v1269_v4 = vadd.f32 %v941_v53, %v232_v45  ;;  %2296 = vmatmul.msk.f32.gmra.mxu1 %vm394_vm0, %v375_v38  ;;  %v1517_v38 = vunpack.c.3.s8 %v2974_v55  ;;  %v1708_v55 = vcvt.s32.f32 %v1516_v34  ;;  %v3032_v24 = vld [vmem:[%s3306_s3 + $0xc8] sm:$0xff]  ;;  %v3043_v53 = vld [vmem:[%s3306_s3 + $0xd8] sm:$0xff] }
 0x13d   :  { %v1270_v6 = vadd.f32 %v1102_v1, %v233_v48  ;;  %v241_v45 = vunpack.c.h.bf16 %v97_v35  ;;  %v1711_v61 = vcvt.s32.f32 %v1519_v58  ;;  %v379_v34 = vld [vmem:[%s3304_s1 + $0x148] sm:$0xff]  ;;  %v1715_v35 = vcvt.s32.f32 %v1523_v17 }
 0x13e   :  { %v2041_v2 = vpack.c.bf16 %v1892_v57, %v1891_v51  ;;  %v1893_v3 = vmul.f32 %v1701_v52, %v1269_v4  ;;  %v1709_v49 = vcvt.s32.f32 %v1517_v38  ;;  %v3038_v51 = vld [vmem:[%s3306_s3 + $0xd0] sm:$0xff]  ;;  %v1520_v4 = vunpack.c.0.s8 %v3032_v24 }
 0x13f   :  { %v1894_v5 = vmul.f32 %v1702_v0, %v1270_v6  ;;  %v242_v0 = vunpack.c.l.bf16 %v98_v56  ;;  %v99_v6 = vld [vmem:[#allocation2 + $0x188] sm:$0xff] }
 0x140   :  { %v622_v8 = vpop.f32.mrf.mxu0  ;;  %2137 = vst [vmem:[#allocation7 + $0x150] sm:$0xff] %v2041_v2  ;;  %2345 = vmatmul.msk.f32.gmra.mxu2 %vm394_vm0, %v376_v11  ;;  %v244_v7 = vunpack.c.l.bf16 %v99_v6 }
 0x141   :  { %v2042_v12 = vpack.c.bf16 %v1894_v5, %v1893_v3  ;;  %2393 = vmatmul.msk.f32.gmra.mxu3 %vm394_vm0, %v376_v11  ;;  %v1271_v13 = vadd.f32 %v622_v8, %v234_v29  ;;  %v783_v18 = vpop.f32.mrf.mxu1  ;;  %v1522_v3 = vunpack.c.0.s8 %v3043_v53 }
 0x142   :  { %v1272_v21 = vadd.f32 %v783_v18, %v235_v15 }
 0x143   :  { %2138 = vst [vmem:[#allocation7 + $0x158] sm:$0xff] %v2042_v12  ;;  %v1895_v20 = vmul.f32 %v1703_v26, %v1271_v13  ;;  %2249 = vmatmul.msk.f32.gmra.mxu0 %vm394_vm0, %v376_v11  ;;  %v944_v25 = vpop.f32.mrf.mxu2  ;;  %v1521_v26 = vunpack.c.0.s8 %v3038_v51  ;;  %v1712_v12 = vcvt.s32.f32 %v1520_v4  ;;  %v245_v13 = vunpack.c.h.bf16 %v99_v6  ;;  %v380_v4 = vld [vmem:[%s3304_s1 + $0x150] sm:$0xff] }
 0x144   :  { %v1105_v27 = vpop.f32.mrf.mxu3  ;;  %v1896_v31 = vmul.f32 %v1704_v14, %v1272_v21  ;;  %v1273_v32 = vadd.f32 %v944_v25, %v236_v10  ;;  %2297 = vmatmul.msk.f32.gmra.mxu1 %vm394_vm0, %v376_v11  ;;  %v243_v11 = vunpack.c.h.bf16 %v98_v56  ;;  %v100_v14 = vld [vmem:[#allocation2 + $0x190] sm:$0xff]  ;;  %v1714_v21 = vcvt.s32.f32 %v1522_v3 }
 0x145   :  { %v1274_v33 = vadd.f32 %v1105_v27, %v237_v16  ;;  %v246_v25 = vunpack.c.l.bf16 %v100_v14  ;;  %v1527_v56 = vunpack.c.2.s8 %v3024_v42 }
 0x146   :  { %v2043_v39 = vpack.c.bf16 %v1896_v31, %v1895_v20  ;;  %v1897_v50 = vmul.f32 %v1705_v22, %v1273_v32  ;;  %v1713_v20 = vcvt.s32.f32 %v1521_v26  ;;  %v1524_v32 = vunpack.c.1.s8 %v3032_v24 }
 0x147   :  { %v1898_v40 = vmul.f32 %v1706_v23, %v1274_v33  ;;  %v101_v33 = vld [vmem:[#allocation2 + $0x198] sm:$0xff]  ;;  %v1719_v6 = vcvt.s32.f32 %v1527_v56 }
 0x148   :  { %v625_v63 = vpop.f32.mrf.mxu0  ;;  %2139 = vst [vmem:[#allocation7 + $0x160] sm:$0xff] %v2043_v39  ;;  %2346 = vmatmul.msk.f32.gmra.mxu2 %vm394_vm0, %v377_v46  ;;  %v248_v41 = vunpack.c.l.bf16 %v101_v33 }
 0x149   :  { %v2044_v54 = vpack.c.bf16 %v1898_v40, %v1897_v50  ;;  %2394 = vmatmul.msk.f32.gmra.mxu3 %vm394_vm0, %v377_v46  ;;  %v1275_v44 = vadd.f32 %v625_v63, %v238_v30  ;;  %v786_v47 = vpop.f32.mrf.mxu1  ;;  %v1526_v50 = vunpack.c.1.s8 %v3043_v53 }
 0x14a   :  { %v1276_v59 = vadd.f32 %v786_v47, %v239_v37 }
 0x14b   :  { %2140 = vst [vmem:[#allocation7 + $0x168] sm:$0xff] %v2044_v54  ;;  %v1899_v48 = vmul.f32 %v1707_v36, %v1275_v44  ;;  %2250 = vmatmul.msk.f32.gmra.mxu0 %vm394_vm0, %v377_v46  ;;  %v947_v62 = vpop.f32.mrf.mxu2  ;;  %v1525_v36 = vunpack.c.1.s8 %v3038_v51  ;;  %v1716_v54 = vcvt.s32.f32 %v1524_v32  ;;  %v249_v44 = vunpack.c.h.bf16 %v101_v33 }
 0x14c   :  { %v1108_v52 = vpop.f32.mrf.mxu3  ;;  %v1900_v1 = vmul.f32 %v1708_v55, %v1276_v59  ;;  %v1277_v29 = vadd.f32 %v947_v62, %v240_v43  ;;  %2298 = vmatmul.msk.f32.gmra.mxu1 %vm394_vm0, %v377_v46  ;;  %v247_v46 = vunpack.c.h.bf16 %v100_v14  ;;  %v102_v55 = vld [vmem:[#allocation2 + $0x1a0] sm:$0xff]  ;;  %v1718_v59 = vcvt.s32.f32 %v1526_v50 }
 0x14d   :  { %v1278_v57 = vadd.f32 %v1108_v52, %v241_v45  ;;  %v250_v62 = vunpack.c.l.bf16 %v102_v55  ;;  %v1531_v14 = vunpack.c.3.s8 %v3024_v42  ;;  %v381_v42 = vld [vmem:[%s3304_s1 + $0x158] sm:$0xff] }
 0x14e   :  { %v2045_v15 = vpack.c.bf16 %v1900_v1, %v1899_v48  ;;  %v1901_v28 = vmul.f32 %v1709_v49, %v1277_v29  ;;  %v1717_v48 = vcvt.s32.f32 %v1525_v36  ;;  %v1528_v29 = vunpack.c.2.s8 %v3032_v24 }
 0x14f   :  { %v1902_v2 = vmul.f32 %v1710_v60, %v1278_v57  ;;  %v103_v57 = vld [vmem:[#allocation2 + $0x1a8] sm:$0xff]  ;;  %v1723_v32 = vcvt.s32.f32 %v1531_v14 }
 0x150   :  { %v628_v5 = vpop.f32.mrf.mxu0  ;;  %2141 = vst [vmem:[#allocation7 + $0x170] sm:$0xff] %v2045_v15  ;;  %2347 = vmatmul.msk.f32.gmra.mxu2 %vm394_vm0, %v378_v9  ;;  %v252_v3 = vunpack.c.l.bf16 %v103_v57 }
 0x151   :  { %v2046_v8 = vpack.c.bf16 %v1902_v2, %v1901_v28  ;;  %2395 = vmatmul.msk.f32.gmra.mxu3 %vm394_vm0, %v378_v9  ;;  %v1279_v10 = vadd.f32 %v628_v5, %v242_v0  ;;  %v789_v16 = vpop.f32.mrf.mxu1  ;;  %v1530_v28 = vunpack.c.2.s8 %v3043_v53 }
 0x152   :  { %v1280_v19 = vadd.f32 %v789_v16, %v243_v11 }
 0x153   :  { %2142 = vst [vmem:[#allocation7 + $0x178] sm:$0xff] %v2046_v8  ;;  %v1903_v18 = vmul.f32 %v1711_v61, %v1279_v10  ;;  %2251 = vmatmul.msk.f32.gmra.mxu0 %vm394_vm0, %v378_v9  ;;  %v950_v22 = vpop.f32.mrf.mxu2  ;;  %v1529_v61 = vunpack.c.2.s8 %v3038_v51  ;;  %v1720_v8 = vcvt.s32.f32 %v1528_v29  ;;  %v253_v10 = vunpack.c.h.bf16 %v103_v57  ;;  %v382_v29 = vld [vmem:[%s3304_s1 + $0x160] sm:$0xff] }
 0x154   :  { %v1111_v23 = vpop.f32.mrf.mxu3  ;;  %v1904_v27 = vmul.f32 %v1712_v12, %v1280_v19  ;;  %v1281_v30 = vadd.f32 %v950_v22, %v244_v7  ;;  %2299 = vmatmul.msk.f32.gmra.mxu1 %vm394_vm0, %v378_v9  ;;  %v251_v9 = vunpack.c.h.bf16 %v102_v55  ;;  %v104_v12 = vld [vmem:[#allocation2 + $0x1b0] sm:$0xff]  ;;  %v1722_v19 = vcvt.s32.f32 %v1530_v28 }
 0x155   :  { %v1282_v31 = vadd.f32 %v1111_v23, %v245_v13  ;;  %v254_v22 = vunpack.c.l.bf16 %v104_v12  ;;  %v255_v33 = vunpack.c.h.bf16 %v104_v12 }
 0x156   :  { %v2047_v37 = vpack.c.bf16 %v1904_v27, %v1903_v18  ;;  %v1905_v38 = vmul.f32 %v1713_v20, %v1281_v30  ;;  %v1721_v18 = vcvt.s32.f32 %v1529_v61  ;;  %v1532_v30 = vunpack.c.3.s8 %v3032_v24 }
 0x157   :  { %v1906_v39 = vmul.f32 %v1714_v21, %v1282_v31  ;;  %v105_v31 = vld [vmem:[#allocation2 + $0x1b8] sm:$0xff] }
 0x158   :  { %v631_v40 = vpop.f32.mrf.mxu0  ;;  %2143 = vst [vmem:[#allocation7 + $0x180] sm:$0xff] %v2047_v37  ;;  %2348 = vmatmul.msk.f32.gmra.mxu2 %vm394_vm0, %v379_v34  ;;  %v1534_v37 = vunpack.c.3.s8 %v3043_v53 }
 0x159   :  { %v2048_v63 = vpack.c.bf16 %v1906_v39, %v1905_v38  ;;  %2396 = vmatmul.msk.f32.gmra.mxu3 %vm394_vm0, %v379_v34  ;;  %v1283_v43 = vadd.f32 %v631_v40, %v246_v25  ;;  %v792_v45 = vpop.f32.mrf.mxu1  ;;  %v3088_v38 = vld [vmem:[%s3306_s3 + $0xe0] sm:$0xff]  ;;  %v256_v39 = vunpack.c.l.bf16 %v105_v31 }
 0x15a   :  { %v1284_v58 = vadd.f32 %v792_v45, %v247_v46  ;;  %v1535_v53 = vunpack.c.0.s8 %v3088_v38  ;;  %v1726_v56 = vcvt.s32.f32 %v1534_v37  ;;  %v1539_v12 = vunpack.c.1.s8 %v3088_v38 }
 0x15b   :  { %2144 = vst [vmem:[#allocation7 + $0x188] sm:$0xff] %v2048_v63  ;;  %v1907_v47 = vmul.f32 %v1715_v35, %v1283_v43  ;;  %2252 = vmatmul.msk.f32.gmra.mxu0 %vm394_vm0, %v379_v34  ;;  %v953_v49 = vpop.f32.mrf.mxu2  ;;  %v106_v63 = vld [vmem:[#allocation2 + $0x1c0] sm:$0xff] }
 0x15c   :  { %v1114_v60 = vpop.f32.mrf.mxu3  ;;  %v1908_v52 = vmul.f32 %v1716_v54, %v1284_v58  ;;  %v1285_v0 = vadd.f32 %v953_v49, %v248_v41  ;;  %2300 = vmatmul.msk.f32.gmra.mxu1 %vm394_vm0, %v379_v34  ;;  %v1533_v34 = vunpack.c.3.s8 %v3038_v51  ;;  %v1724_v51 = vcvt.s32.f32 %v1532_v30  ;;  %v3096_v54 = vld [vmem:[%s3306_s3 + $0xe8] sm:$0xff]  ;;  %v3107_v49 = vld [vmem:[%s3306_s3 + $0xf8] sm:$0xff] }
 0x15d   :  { %v1286_v1 = vadd.f32 %v1114_v60, %v249_v44  ;;  %v257_v41 = vunpack.c.h.bf16 %v105_v31  ;;  %v1727_v57 = vcvt.s32.f32 %v1535_v53  ;;  %v383_v30 = vld [vmem:[%s3304_s1 + $0x168] sm:$0xff]  ;;  %v1731_v31 = vcvt.s32.f32 %v1539_v12 }
 0x15e   :  { %v2049_v11 = vpack.c.bf16 %v1908_v52, %v1907_v47  ;;  %v1909_v26 = vmul.f32 %v1717_v48, %v1285_v0  ;;  %v1725_v45 = vcvt.s32.f32 %v1533_v34  ;;  %v3102_v47 = vld [vmem:[%s3306_s3 + $0xf0] sm:$0xff]  ;;  %v1536_v0 = vunpack.c.0.s8 %v3096_v54 }
 0x15f   :  { %v1910_v15 = vmul.f32 %v1718_v59, %v1286_v1  ;;  %v258_v59 = vunpack.c.l.bf16 %v106_v63  ;;  %v107_v1 = vld [vmem:[#allocation2 + $0x1c8] sm:$0xff] }
 0x160   :  { %v634_v2 = vpop.f32.mrf.mxu0  ;;  %2145 = vst [vmem:[#allocation7 + $0x190] sm:$0xff] %v2049_v11  ;;  %2349 = vmatmul.msk.f32.gmra.mxu2 %vm394_vm0, %v380_v4  ;;  %v260_v28 = vunpack.c.l.bf16 %v107_v1 }
 0x161   :  { %v2050_v5 = vpack.c.bf16 %v1910_v15, %v1909_v26  ;;  %2397 = vmatmul.msk.f32.gmra.mxu3 %vm394_vm0, %v380_v4  ;;  %v1287_v7 = vadd.f32 %v634_v2, %v250_v62  ;;  %v795_v13 = vpop.f32.mrf.mxu1  ;;  %v1538_v26 = vunpack.c.0.s8 %v3107_v49 }
 0x162   :  { %v1288_v17 = vadd.f32 %v795_v13, %v251_v9 }
 0x163   :  { %2146 = vst [vmem:[#allocation7 + $0x198] sm:$0xff] %v2050_v5  ;;  %v1911_v16 = vmul.f32 %v1719_v6, %v1287_v7  ;;  %2253 = vmatmul.msk.f32.gmra.mxu0 %vm394_vm0, %v380_v4  ;;  %v956_v20 = vpop.f32.mrf.mxu2  ;;  %v1537_v6 = vunpack.c.0.s8 %v3102_v47  ;;  %v1728_v5 = vcvt.s32.f32 %v1536_v0  ;;  %v261_v7 = vunpack.c.h.bf16 %v107_v1  ;;  %v384_v0 = vld [vmem:[%s3304_s1 + $0x170] sm:$0xff] }
 0x164   :  { %v1117_v21 = vpop.f32.mrf.mxu3  ;;  %v1912_v23 = vmul.f32 %v1720_v8, %v1288_v17  ;;  %v1289_v25 = vadd.f32 %v956_v20, %v252_v3  ;;  %2301 = vmatmul.msk.f32.gmra.mxu1 %vm394_vm0, %v380_v4  ;;  %v259_v4 = vunpack.c.h.bf16 %v106_v63  ;;  %v108_v8 = vld [vmem:[#allocation2 + $0x1d0] sm:$0xff]  ;;  %v1730_v17 = vcvt.s32.f32 %v1538_v26 }
 0x165   :  { %v1290_v27 = vadd.f32 %v1117_v21, %v253_v10  ;;  %v262_v20 = vunpack.c.l.bf16 %v108_v8  ;;  %v1543_v63 = vunpack.c.2.s8 %v3088_v38 }
 0x166   :  { %v2051_v35 = vpack.c.bf16 %v1912_v23, %v1911_v16  ;;  %v1913_v46 = vmul.f32 %v1721_v18, %v1289_v25  ;;  %v1729_v16 = vcvt.s32.f32 %v1537_v6  ;;  %v1540_v25 = vunpack.c.1.s8 %v3096_v54 }
 0x167   :  { %v1914_v36 = vmul.f32 %v1722_v19, %v1290_v27  ;;  %v109_v27 = vld [vmem:[#allocation2 + $0x1d8] sm:$0xff]  ;;  %v1735_v1 = vcvt.s32.f32 %v1543_v63 }
 0x168   :  { %v637_v24 = vpop.f32.mrf.mxu0  ;;  %2147 = vst [vmem:[#allocation7 + $0x1a0] sm:$0xff] %v2051_v35  ;;  %2350 = vmatmul.msk.f32.gmra.mxu2 %vm394_vm0, %v381_v42  ;;  %v264_v37 = vunpack.c.l.bf16 %v109_v27 }
 0x169   :  { %v2052_v50 = vpack.c.bf16 %v1914_v36, %v1913_v46  ;;  %2398 = vmatmul.msk.f32.gmra.mxu3 %vm394_vm0, %v381_v42  ;;  %v1291_v40 = vadd.f32 %v637_v24, %v254_v22  ;;  %v798_v43 = vpop.f32.mrf.mxu1  ;;  %v1542_v46 = vunpack.c.1.s8 %v3107_v49 }
 0x16a   :  { %v1292_v55 = vadd.f32 %v798_v43, %v255_v33 }
 0x16b   :  { %2148 = vst [vmem:[#allocation7 + $0x1a8] sm:$0xff] %v2052_v50  ;;  %v1915_v44 = vmul.f32 %v1723_v32, %v1291_v40  ;;  %2254 = vmatmul.msk.f32.gmra.mxu0 %vm394_vm0, %v381_v42  ;;  %v959_v58 = vpop.f32.mrf.mxu2  ;;  %v1541_v32 = vunpack.c.1.s8 %v3102_v47  ;;  %v1732_v50 = vcvt.s32.f32 %v1540_v25  ;;  %v265_v40 = vunpack.c.h.bf16 %v109_v27 }
 0x16c   :  { %v1120_v48 = vpop.f32.mrf.mxu3  ;;  %v1916_v60 = vmul.f32 %v1724_v51, %v1292_v55  ;;  %v1293_v62 = vadd.f32 %v959_v58, %v256_v39  ;;  %2302 = vmatmul.msk.f32.gmra.mxu1 %vm394_vm0, %v381_v42  ;;  %v263_v42 = vunpack.c.h.bf16 %v108_v8  ;;  %v110_v51 = vld [vmem:[#allocation2 + $0x1e0] sm:$0xff]  ;;  %v1734_v55 = vcvt.s32.f32 %v1542_v46 }
 0x16d   :  { %v1294_v52 = vadd.f32 %v1120_v48, %v257_v41  ;;  %v266_v58 = vunpack.c.l.bf16 %v110_v51  ;;  %v1547_v8 = vunpack.c.3.s8 %v3088_v38  ;;  %v385_v38 = vld [vmem:[%s3304_s1 + $0x178] sm:$0xff] }
 0x16e   :  { %v2053_v9 = vpack.c.bf16 %v1916_v60, %v1915_v44  ;;  %v1917_v61 = vmul.f32 %v1725_v45, %v1293_v62  ;;  %v1733_v44 = vcvt.s32.f32 %v1541_v32  ;;  %v1544_v62 = vunpack.c.2.s8 %v3096_v54 }
 0x16f   :  { %v1918_v11 = vmul.f32 %v1726_v56, %v1294_v52  ;;  %v111_v52 = vld [vmem:[#allocation2 + $0x1e8] sm:$0xff]  ;;  %v1739_v25 = vcvt.s32.f32 %v1547_v8 }
 0x170   :  { %v640_v15 = vpop.f32.mrf.mxu0  ;;  %2149 = vst [vmem:[#allocation7 + $0x1b0] sm:$0xff] %v2053_v9  ;;  %2351 = vmatmul.msk.f32.gmra.mxu2 %vm394_vm0, %v382_v29  ;;  %v268_v26 = vunpack.c.l.bf16 %v111_v52 }
 0x171   :  { %v2054_v2 = vpack.c.bf16 %v1918_v11, %v1917_v61  ;;  %2399 = vmatmul.msk.f32.gmra.mxu3 %vm394_vm0, %v382_v29  ;;  %v1295_v3 = vadd.f32 %v640_v15, %v258_v59  ;;  %v801_v10 = vpop.f32.mrf.mxu1  ;;  %v1546_v61 = vunpack.c.2.s8 %v3107_v49 }
 0x172   :  { %v1296_v14 = vadd.f32 %v801_v10, %v259_v4 }
 0x173   :  { %2150 = vst [vmem:[#allocation7 + $0x1b8] sm:$0xff] %v2054_v2  ;;  %v1919_v13 = vmul.f32 %v1727_v57, %v1295_v3  ;;  %2255 = vmatmul.msk.f32.gmra.mxu0 %vm394_vm0, %v382_v29  ;;  %v962_v18 = vpop.f32.mrf.mxu2  ;;  %v1545_v57 = vunpack.c.2.s8 %v3102_v47  ;;  %v1736_v2 = vcvt.s32.f32 %v1544_v62  ;;  %v269_v3 = vunpack.c.h.bf16 %v111_v52 }
 0x174   :  { %v1123_v19 = vpop.f32.mrf.mxu3  ;;  %v1920_v21 = vmul.f32 %v1728_v5, %v1296_v14  ;;  %v1297_v22 = vadd.f32 %v962_v18, %v260_v28  ;;  %2303 = vmatmul.msk.f32.gmra.mxu1 %vm394_vm0, %v382_v29  ;;  %v267_v29 = vunpack.c.h.bf16 %v110_v51  ;;  %v112_v5 = vld [vmem:[#allocation2 + $0x1f0] sm:$0xff]  ;;  %v1738_v14 = vcvt.s32.f32 %v1546_v61 }
 0x175   :  { %v1298_v23 = vadd.f32 %v1123_v19, %v261_v7  ;;  %v270_v18 = vunpack.c.l.bf16 %v112_v5  ;;  %v271_v27 = vunpack.c.h.bf16 %v112_v5 }
 0x176   :  { %v2055_v33 = vpack.c.bf16 %v1920_v21, %v1919_v13  ;;  %v1921_v34 = vmul.f32 %v1729_v16, %v1297_v22  ;;  %v1737_v13 = vcvt.s32.f32 %v1545_v57  ;;  %v1548_v22 = vunpack.c.3.s8 %v3096_v54 }
 0x177   :  { %v1922_v35 = vmul.f32 %v1730_v17, %v1298_v23  ;;  %v113_v23 = vld [vmem:[#allocation2 + $0x1f8] sm:$0xff] }
 0x178   :  { %v643_v36 = vpop.f32.mrf.mxu0  ;;  %2151 = vst [vmem:[#allocation7 + $0x1c0] sm:$0xff] %v2055_v33  ;;  %2352 = vmatmul.msk.f32.gmra.mxu2 %vm394_vm0, %v383_v30  ;;  %v1550_v33 = vunpack.c.3.s8 %v3107_v49 }
 0x179   :  { %v2056_v24 = vpack.c.bf16 %v1922_v35, %v1921_v34  ;;  %2400 = vmatmul.msk.f32.gmra.mxu3 %vm394_vm0, %v383_v30  ;;  %v1299_v39 = vadd.f32 %v643_v36, %v262_v20  ;;  %v804_v41 = vpop.f32.mrf.mxu1  ;;  %v3152_v34 = vld [vmem:[%s3306_s3 + $0x100] sm:$0xff]  ;;  %v272_v35 = vunpack.c.l.bf16 %v113_v23 }
 0x17a   :  { %v1300_v53 = vadd.f32 %v804_v41, %v263_v42  ;;  %v1551_v49 = vunpack.c.0.s8 %v3152_v34  ;;  %v1742_v63 = vcvt.s32.f32 %v1550_v33 }
 0x17b   :  { %2152 = vst [vmem:[#allocation7 + $0x1c8] sm:$0xff] %v2056_v24  ;;  %v1923_v43 = vmul.f32 %v1731_v31, %v1299_v39  ;;  %2256 = vmatmul.msk.f32.gmra.mxu0 %vm394_vm0, %v383_v30  ;;  %v965_v45 = vpop.f32.mrf.mxu2  ;;  %v114_v24 = vld [vmem:[#allocation2 + $0x200] sm:$0xff] }
 0x17c   :  { %v1126_v56 = vpop.f32.mrf.mxu3  ;;  %v1924_v48 = vmul.f32 %v1732_v50, %v1300_v53  ;;  %v1301_v59 = vadd.f32 %v965_v45, %v264_v37  ;;  %2304 = vmatmul.msk.f32.gmra.mxu1 %vm394_vm0, %v383_v30  ;;  %v1549_v30 = vunpack.c.3.s8 %v3102_v47  ;;  %v1740_v47 = vcvt.s32.f32 %v1548_v22  ;;  %v3160_v50 = vld [vmem:[%s3306_s3 + $0x108] sm:$0xff]  ;;  %v3171_v45 = vld [vmem:[%s3306_s3 + $0x118] sm:$0xff] }
 0x17d   :  { %v1302_v60 = vadd.f32 %v1126_v56, %v265_v40  ;;  %v273_v37 = vunpack.c.h.bf16 %v113_v23  ;;  %v1743_v62 = vcvt.s32.f32 %v1551_v49  ;;  %v275_v52 = vunpack.c.h.bf16 %v114_v24 }
 0x17e   :  { %v2057_v4 = vpack.c.bf16 %v1924_v48, %v1923_v43  ;;  %v1925_v6 = vmul.f32 %v1733_v44, %v1301_v59  ;;  %v1741_v41 = vcvt.s32.f32 %v1549_v30  ;;  %v3166_v43 = vld [vmem:[%s3306_s3 + $0x110] sm:$0xff]  ;;  %v1552_v59 = vunpack.c.0.s8 %v3160_v50 }
 0x17f   :  { %v1926_v9 = vmul.f32 %v1734_v55, %v1302_v60  ;;  %v274_v55 = vunpack.c.l.bf16 %v114_v24  ;;  %v115_v60 = vld [vmem:[#allocation2 + $0x208] sm:$0xff]  ;;  %v1557_v23 = vunpack.c.1.s8 %v3166_v43  ;;  %v1558_v30 = vunpack.c.1.s8 %v3171_v45 }
 0x180   :  { %v646_v11 = vpop.f32.mrf.mxu0  ;;  %2153 = vst [vmem:[#allocation7 + $0x1d0] sm:$0xff] %v2057_v4  ;;  %2353 = vmatmul.msk.f32.gmra.mxu2 %vm394_vm0, %v384_v0  ;;  %v1554_v4 = vunpack.c.0.s8 %v3171_v45 }
 0x181   :  { %v2058_v15 = vpack.c.bf16 %v1926_v9, %v1925_v6  ;;  %2401 = vmatmul.msk.f32.gmra.mxu3 %vm394_vm0, %v384_v0  ;;  %v1303_v28 = vadd.f32 %v646_v11, %v266_v58  ;;  %v807_v7 = vpop.f32.mrf.mxu1  ;;  %v276_v9 = vunpack.c.l.bf16 %v115_v60  ;;  %v1750_v49 = vcvt.s32.f32 %v1558_v30 }
 0x182   :  { %v1304_v12 = vadd.f32 %v807_v7, %v267_v29 }
 0x183   :  { %2154 = vst [vmem:[#allocation7 + $0x1d8] sm:$0xff] %v2058_v15  ;;  %v1927_v10 = vmul.f32 %v1735_v1, %v1303_v28  ;;  %2257 = vmatmul.msk.f32.gmra.mxu0 %vm394_vm0, %v384_v0  ;;  %v968_v16 = vpop.f32.mrf.mxu2  ;;  %v277_v15 = vunpack.c.h.bf16 %v115_v60  ;;  %v116_v28 = vld [vmem:[#allocation2 + $0x210] sm:$0xff] }
 0x184   :  { %v1129_v17 = vpop.f32.mrf.mxu3  ;;  %v1928_v19 = vmul.f32 %v1736_v2, %v1304_v12  ;;  %v1305_v20 = vadd.f32 %v968_v16, %v268_v26  ;;  %2305 = vmatmul.msk.f32.gmra.mxu1 %vm394_vm0, %v384_v0  ;;  %v1553_v0 = vunpack.c.0.s8 %v3166_v43  ;;  %v1744_v26 = vcvt.s32.f32 %v1552_v59 }
 0x185   :  { %v1306_v21 = vadd.f32 %v1129_v17, %v269_v3  ;;  %v1555_v3 = vunpack.c.1.s8 %v3152_v34  ;;  %v279_v22 = vunpack.c.h.bf16 %v116_v28  ;;  %v1561_v59 = vunpack.c.2.s8 %v3166_v43 }
 0x186   :  { %v2059_v31 = vpack.c.bf16 %v1928_v19, %v1927_v10  ;;  %v1929_v42 = vmul.f32 %v1737_v13, %v1305_v20  ;;  %v1745_v8 = vcvt.s32.f32 %v1553_v0  ;;  %v1746_v10 = vcvt.s32.f32 %v1554_v4  ;;  %v117_v20 = vld [vmem:[#allocation2 + $0x218] sm:$0xff] }
 0x187   :  { %v1930_v32 = vmul.f32 %v1738_v14, %v1306_v21  ;;  %v278_v14 = vunpack.c.l.bf16 %v116_v28  ;;  %v1556_v19 = vunpack.c.1.s8 %v3160_v50  ;;  %v1747_v21 = vcvt.s32.f32 %v1555_v3 }
 0x188   :  { %v649_v54 = vpop.f32.mrf.mxu0  ;;  %2155 = vst [vmem:[#allocation7 + $0x1e0] sm:$0xff] %v2059_v31  ;;  %2354 = vmatmul.msk.f32.gmra.mxu2 %vm394_vm0, %v385_v38  ;;  %v1562_v0 = vunpack.c.2.s8 %v3171_v45 }
 0x189   :  { %v2060_v46 = vpack.c.bf16 %v1930_v32, %v1929_v42  ;;  %2402 = vmatmul.msk.f32.gmra.mxu3 %vm394_vm0, %v385_v38  ;;  %v1307_v36 = vadd.f32 %v649_v54, %v270_v18  ;;  %v810_v39 = vpop.f32.mrf.mxu1  ;;  %v280_v42 = vunpack.c.l.bf16 %v117_v20  ;;  %v1748_v54 = vcvt.s32.f32 %v1556_v19 }
 0x18a   :  { %v1308_v51 = vadd.f32 %v810_v39, %v271_v27  ;;  %v1749_v39 = vcvt.s32.f32 %v1557_v23  ;;  %v1754_v3 = vcvt.s32.f32 %v1562_v0  ;;  %v1565_v19 = vunpack.c.3.s8 %v3166_v43  ;;  %v3192_v23 = vld [vmem:[%s3306_s3 + $0x120] sm:$0xff] }
 0x18b   :  { %2156 = vst [vmem:[#allocation7 + $0x1e8] sm:$0xff] %v2060_v46  ;;  %v1931_v40 = vmul.f32 %v1739_v25, %v1307_v36  ;;  %2258 = vmatmul.msk.f32.gmra.mxu0 %vm394_vm0, %v385_v38  ;;  %v971_v53 = vpop.f32.mrf.mxu2  ;;  %v118_v46 = vld [vmem:[#allocation2 + $0x220] sm:$0xff]  ;;  %v1567_v43 = vunpack.c.0.s8 %v3192_v23 }
 0x18c   :  { %v1132_v44 = vpop.f32.mrf.mxu3  ;;  %v1932_v56 = vmul.f32 %v1740_v47, %v1308_v51  ;;  %v1309_v58 = vadd.f32 %v971_v53, %v272_v35  ;;  %2306 = vmatmul.msk.f32.gmra.mxu1 %vm394_vm0, %v385_v38  ;;  %v281_v35 = vunpack.c.h.bf16 %v117_v20  ;;  %v1559_v47 = vunpack.c.2.s8 %v3152_v34 }
 0x18d   :  { %v1310_v48 = vadd.f32 %v1132_v44, %v273_v37 }
 0x18e   :  { %v2061_v1 = vpack.c.bf16 %v1932_v56, %v1931_v40  ;;  %v1933_v29 = vmul.f32 %v1741_v41, %v1309_v58  ;;  %v282_v41 = vunpack.c.l.bf16 %v118_v46  ;;  %v119_v56 = vld [vmem:[#allocation2 + $0x228] sm:$0xff]  ;;  %v1751_v58 = vcvt.s32.f32 %v1559_v47 }
 0x18f   :  { %v1934_v57 = vmul.f32 %v1742_v63, %v1310_v48  ;;  %v283_v48 = vunpack.c.h.bf16 %v118_v46 }
 0x190   :  { %v652_v6 = vpop.f32.mrf.mxu0  ;;  %2157 = vst [vmem:[#allocation7 + $0x1f0] sm:$0xff] %v2061_v1 }
 0x191   :  { %v2062_v61 = vpack.c.bf16 %v1934_v57, %v1933_v29  ;;  %v1311_v11 = vadd.f32 %v652_v6, %v274_v55  ;;  %v813_v2 = vpop.f32.mrf.mxu1  ;;  %v1560_v55 = vunpack.c.2.s8 %v3160_v50  ;;  %v284_v29 = vunpack.c.l.bf16 %v119_v56 }
 0x192   :  { %v1312_v7 = vadd.f32 %v813_v2, %v275_v52  ;;  %v1753_v2 = vcvt.s32.f32 %v1561_v59 }
 0x193   :  { %2158 = vst [vmem:[#allocation7 + $0x1f8] sm:$0xff] %v2062_v61  ;;  %v1935_v5 = vmul.f32 %v1743_v62, %v1311_v11  ;;  %v974_v12 = vpop.f32.mrf.mxu2  ;;  %v1752_v6 = vcvt.s32.f32 %v1560_v55  ;;  %v120_v61 = vld [vmem:[#allocation2 + $0x230] sm:$0xff] }
 0x194   :  { %v1135_v13 = vpop.f32.mrf.mxu3  ;;  %v1936_v16 = vmul.f32 %v1744_v26, %v1312_v7  ;;  %v1313_v17 = vadd.f32 %v974_v12, %v276_v9  ;;  %v285_v9 = vunpack.c.h.bf16 %v119_v56  ;;  %v1563_v26 = vunpack.c.3.s8 %v3152_v34 }
 0x195   :  { %v1314_v18 = vadd.f32 %v1135_v13, %v277_v15 }
 0x196   :  { %v2063_v38 = vpack.c.bf16 %v1936_v16, %v1935_v5  ;;  %v1937_v25 = vmul.f32 %v1745_v8, %v1313_v17  ;;  %v286_v8 = vunpack.c.l.bf16 %v120_v61  ;;  %v121_v16 = vld [vmem:[#allocation2 + $0x238] sm:$0xff]  ;;  %v1755_v17 = vcvt.s32.f32 %v1563_v26 }
 0x197   :  { %v1938_v27 = vmul.f32 %v1746_v10, %v1314_v18  ;;  %v287_v18 = vunpack.c.h.bf16 %v120_v61 }
 0x198   :  { %v655_v31 = vpop.f32.mrf.mxu0  ;;  %2159 = vst [vmem:[#allocation7 + $0x200] sm:$0xff] %v2063_v38 }
 0x199   :  { %v2064_v32 = vpack.c.bf16 %v1938_v27, %v1937_v25  ;;  %v1315_v33 = vadd.f32 %v655_v31, %v278_v14  ;;  %v816_v36 = vpop.f32.mrf.mxu1  ;;  %v1564_v14 = vunpack.c.3.s8 %v3160_v50  ;;  %v288_v25 = vunpack.c.l.bf16 %v121_v16 }
 0x19a   :  { %v1316_v24 = vadd.f32 %v816_v36, %v279_v22  ;;  %v1566_v22 = vunpack.c.3.s8 %v3171_v45  ;;  %v289_v31 = vunpack.c.h.bf16 %v121_v16  ;;  %v3198_v45 = vld [vmem:[%s3306_s3 + $0x128] sm:$0xff]  ;;  %v3203_v36 = vld [vmem:[%s3306_s3 + $0x130] sm:$0xff] }
 0x19b   :  { %2160 = vst [vmem:[#allocation7 + $0x208] sm:$0xff] %v2064_v32  ;;  %v1939_v37 = vmul.f32 %v1747_v21, %v1315_v33  ;;  %v977_v40 = vpop.f32.mrf.mxu2  ;;  %v1756_v30 = vcvt.s32.f32 %v1564_v14  ;;  %v1569_v55 = vunpack.c.0.s8 %v3203_v36  ;;  %v1573_v14 = vunpack.c.1.s8 %v3203_v36 }
 0x19c   :  { %v1138_v51 = vpop.f32.mrf.mxu3  ;;  %v1940_v63 = vmul.f32 %v1748_v54, %v1316_v24  ;;  %v1317_v53 = vadd.f32 %v977_v40, %v280_v42  ;;  %v122_v42 = vld [vmem:[#allocation2 + $0x240] sm:$0xff]  ;;  %v1758_v46 = vcvt.s32.f32 %v1566_v22 }
 0x19d   :  { %v1318_v44 = vadd.f32 %v1138_v51, %v281_v35  ;;  %v1757_v35 = vcvt.s32.f32 %v1565_v19  ;;  %v290_v24 = vunpack.c.l.bf16 %v122_v42 }
 0x19e   :  { %v2065_v60 = vpack.c.bf16 %v1940_v63, %v1939_v37  ;;  %v1941_v62 = vmul.f32 %v1749_v39, %v1317_v53  ;;  %v3208_v39 = vld [vmem:[%s3306_s3 + $0x138] sm:$0xff]  ;;  %v123_v63 = vld [vmem:[#allocation2 + $0x248] sm:$0xff]  ;;  %v1759_v53 = vcvt.s32.f32 %v1567_v43 }
 0x19f   :  { %v1942_v52 = vmul.f32 %v1750_v49, %v1318_v44  ;;  %v291_v44 = vunpack.c.h.bf16 %v122_v42  ;;  %v1570_v59 = vunpack.c.0.s8 %v3208_v39  ;;  %v1574_v19 = vunpack.c.1.s8 %v3208_v39 }
 0x1a0   :  { %v658_v1 = vpop.f32.mrf.mxu0  ;;  %2161 = vst [vmem:[#allocation7 + $0x210] sm:$0xff] %v2065_v60 }
 0x1a1   :  { %v2066_v57 = vpack.c.bf16 %v1942_v52, %v1941_v62  ;;  %v1319_v4 = vadd.f32 %v658_v1, %v282_v41  ;;  %v819_v11 = vpop.f32.mrf.mxu1  ;;  %v1568_v41 = vunpack.c.0.s8 %v3198_v45  ;;  %v292_v62 = vunpack.c.l.bf16 %v123_v63 }
 0x1a2   :  { %v1320_v28 = vadd.f32 %v819_v11, %v283_v48  ;;  %v1761_v11 = vcvt.s32.f32 %v1569_v55  ;;  %v1762_v26 = vcvt.s32.f32 %v1570_v59  ;;  %v1766_v43 = vcvt.s32.f32 %v1574_v19 }
 0x1a3   :  { %2162 = vst [vmem:[#allocation7 + $0x218] sm:$0xff] %v2066_v57  ;;  %v1943_v15 = vmul.f32 %v1751_v58, %v1319_v4  ;;  %v980_v5 = vpop.f32.mrf.mxu2  ;;  %v1760_v1 = vcvt.s32.f32 %v1568_v41  ;;  %v124_v57 = vld [vmem:[#allocation2 + $0x250] sm:$0xff]  ;;  %v1577_v41 = vunpack.c.2.s8 %v3203_v36  ;;  %v1578_v55 = vunpack.c.2.s8 %v3208_v39 }
 0x1a4   :  { %v1141_v7 = vpop.f32.mrf.mxu3  ;;  %v1944_v10 = vmul.f32 %v1752_v6, %v1320_v28  ;;  %v1321_v12 = vadd.f32 %v980_v5, %v284_v29  ;;  %v293_v29 = vunpack.c.h.bf16 %v123_v63  ;;  %v1571_v6 = vunpack.c.1.s8 %v3192_v23 }
 0x1a5   :  { %v1322_v13 = vadd.f32 %v1141_v7, %v285_v9 }
 0x1a6   :  { %v2067_v20 = vpack.c.bf16 %v1944_v10, %v1943_v15  ;;  %v1945_v34 = vmul.f32 %v1753_v2, %v1321_v12  ;;  %v294_v2 = vunpack.c.l.bf16 %v124_v57  ;;  %v125_v10 = vld [vmem:[#allocation2 + $0x258] sm:$0xff]  ;;  %v1763_v12 = vcvt.s32.f32 %v1571_v6 }
 0x1a7   :  { %v1946_v21 = vmul.f32 %v1754_v3, %v1322_v13  ;;  %v295_v13 = vunpack.c.h.bf16 %v124_v57  ;;  %v1770_v6 = vcvt.s32.f32 %v1578_v55 }
 0x1a8   :  { %v661_v38 = vpop.f32.mrf.mxu0  ;;  %2163 = vst [vmem:[#allocation7 + $0x220] sm:$0xff] %v2067_v20 }
 0x1a9   :  { %v2068_v27 = vpack.c.bf16 %v1946_v21, %v1945_v34  ;;  %v1323_v50 = vadd.f32 %v661_v38, %v286_v8  ;;  %v822_v32 = vpop.f32.mrf.mxu1  ;;  %v1572_v8 = vunpack.c.1.s8 %v3198_v45  ;;  %v296_v34 = vunpack.c.l.bf16 %v125_v10 }
 0x1aa   :  { %v1324_v54 = vadd.f32 %v822_v32, %v287_v18  ;;  %v1765_v32 = vcvt.s32.f32 %v1573_v14  ;;  %v3228_v14 = vld [vmem:[%s3306_s3 + $0x140] sm:$0xff] }
 0x1ab   :  { %2164 = vst [vmem:[#allocation7 + $0x228] sm:$0xff] %v2068_v27  ;;  %v1947_v33 = vmul.f32 %v1755_v17, %v1323_v50  ;;  %v983_v47 = vpop.f32.mrf.mxu2  ;;  %v1764_v38 = vcvt.s32.f32 %v1572_v8  ;;  %v126_v27 = vld [vmem:[#allocation2 + $0x260] sm:$0xff]  ;;  %v1581_v8 = vunpack.c.3.s8 %v3203_v36  ;;  %v1583_v36 = vunpack.c.0.s8 %v3228_v14 }
 0x1ac   :  { %v1144_v37 = vpop.f32.mrf.mxu3  ;;  %v1948_v49 = vmul.f32 %v1756_v30, %v1324_v54  ;;  %v1325_v40 = vadd.f32 %v983_v47, %v288_v25  ;;  %v297_v25 = vunpack.c.h.bf16 %v125_v10  ;;  %v1575_v30 = vunpack.c.2.s8 %v3192_v23 }
 0x1ad   :  { %v1326_v51 = vadd.f32 %v1144_v37, %v289_v31 }
 0x1ae   :  { %v2069_v56 = vpack.c.bf16 %v1948_v49, %v1947_v33  ;;  %v1949_v58 = vmul.f32 %v1757_v35, %v1325_v40  ;;  %v298_v35 = vunpack.c.l.bf16 %v126_v27  ;;  %v127_v49 = vld [vmem:[#allocation2 + $0x268] sm:$0xff]  ;;  %v1767_v40 = vcvt.s32.f32 %v1575_v30 }
 0x1af   :  { %v1950_v48 = vmul.f32 %v1758_v46, %v1326_v51  ;;  %v299_v51 = vunpack.c.h.bf16 %v126_v27 }
 0x1b0   :  { %v664_v60 = vpop.f32.mrf.mxu0  ;;  %2165 = vst [vmem:[#allocation7 + $0x230] sm:$0xff] %v2069_v56 }
 0x1b1   :  { %v2070_v52 = vpack.c.bf16 %v1950_v48, %v1949_v58  ;;  %v1327_v0 = vadd.f32 %v664_v60, %v290_v24  ;;  %v825_v4 = vpop.f32.mrf.mxu1  ;;  %v1576_v24 = vunpack.c.2.s8 %v3198_v45  ;;  %v300_v58 = vunpack.c.l.bf16 %v127_v49 }
 0x1b2   :  { %v1328_v61 = vadd.f32 %v825_v4, %v291_v44  ;;  %v1769_v4 = vcvt.s32.f32 %v1577_v41 }
 0x1b3   :  { %2166 = vst [vmem:[#allocation7 + $0x238] sm:$0xff] %v2070_v52  ;;  %v1951_v9 = vmul.f32 %v1759_v53, %v1327_v0  ;;  %v986_v15 = vpop.f32.mrf.mxu2  ;;  %v1768_v60 = vcvt.s32.f32 %v1576_v24  ;;  %v128_v52 = vld [vmem:[#allocation2 + $0x270] sm:$0xff] }
 0x1b4   :  { %v1147_v28 = vpop.f32.mrf.mxu3  ;;  %v1952_v3 = vmul.f32 %v1760_v1, %v1328_v61  ;;  %v1329_v5 = vadd.f32 %v986_v15, %v292_v62  ;;  %v301_v62 = vunpack.c.h.bf16 %v127_v49  ;;  %v1579_v1 = vunpack.c.3.s8 %v3192_v23 }
 0x1b5   :  { %v1330_v7 = vadd.f32 %v1147_v28, %v293_v29 }
 0x1b6   :  { %v2071_v16 = vpack.c.bf16 %v1952_v3, %v1951_v9  ;;  %v1953_v17 = vmul.f32 %v1761_v11, %v1329_v5  ;;  %v302_v11 = vunpack.c.l.bf16 %v128_v52  ;;  %v129_v3 = vld [vmem:[#allocation2 + $0x278] sm:$0xff]  ;;  %v1771_v5 = vcvt.s32.f32 %v1579_v1 }
 0x1b7   :  { %v1954_v18 = vmul.f32 %v1762_v26, %v1330_v7  ;;  %v303_v7 = vunpack.c.h.bf16 %v128_v52 }
 0x1b8   :  { %v667_v20 = vpop.f32.mrf.mxu0  ;;  %2167 = vst [vmem:[#allocation7 + $0x240] sm:$0xff] %v2071_v16 }
 0x1b9   :  { %v2072_v21 = vpack.c.bf16 %v1954_v18, %v1953_v17  ;;  %v1331_v22 = vadd.f32 %v667_v20, %v294_v2  ;;  %v828_v50 = vpop.f32.mrf.mxu1  ;;  %v1580_v2 = vunpack.c.3.s8 %v3198_v45  ;;  %v304_v17 = vunpack.c.l.bf16 %v129_v3 }
 0x1ba   :  { %v1332_v42 = vadd.f32 %v828_v50, %v295_v13  ;;  %v1582_v13 = vunpack.c.3.s8 %v3208_v39  ;;  %v305_v20 = vunpack.c.h.bf16 %v129_v3  ;;  %v3234_v39 = vld [vmem:[%s3306_s3 + $0x148] sm:$0xff]  ;;  %v3239_v50 = vld [vmem:[%s3306_s3 + $0x150] sm:$0xff] }
 0x1bb   :  { %2168 = vst [vmem:[#allocation7 + $0x248] sm:$0xff] %v2072_v21  ;;  %v1955_v31 = vmul.f32 %v1763_v12, %v1331_v22  ;;  %v989_v33 = vpop.f32.mrf.mxu2  ;;  %v1772_v19 = vcvt.s32.f32 %v1580_v2  ;;  %v1585_v24 = vunpack.c.0.s8 %v3239_v50  ;;  %v1589_v2 = vunpack.c.1.s8 %v3239_v50 }
 0x1bc   :  { %v1150_v54 = vpop.f32.mrf.mxu3  ;;  %v1956_v46 = vmul.f32 %v1764_v38, %v1332_v42  ;;  %v1333_v47 = vadd.f32 %v989_v33, %v296_v34  ;;  %v130_v34 = vld [vmem:[#allocation2 + $0x280] sm:$0xff]  ;;  %v1774_v27 = vcvt.s32.f32 %v1582_v13 }
 0x1bd   :  { %v1334_v37 = vadd.f32 %v1150_v54, %v297_v25  ;;  %v1773_v25 = vcvt.s32.f32 %v1581_v8  ;;  %v306_v42 = vunpack.c.l.bf16 %v130_v34 }
 0x1be   :  { %v2073_v63 = vpack.c.bf16 %v1956_v46, %v1955_v31  ;;  %v1957_v53 = vmul.f32 %v1765_v32, %v1333_v47  ;;  %v3244_v32 = vld [vmem:[%s3306_s3 + $0x158] sm:$0xff]  ;;  %v131_v46 = vld [vmem:[#allocation2 + $0x288] sm:$0xff]  ;;  %v1775_v47 = vcvt.s32.f32 %v1583_v36 }
 0x1bf   :  { %v1958_v44 = vmul.f32 %v1766_v43, %v1334_v37  ;;  %v307_v37 = vunpack.c.h.bf16 %v130_v34  ;;  %v1586_v41 = vunpack.c.0.s8 %v3244_v32  ;;  %v1590_v8 = vunpack.c.1.s8 %v3244_v32 }
 0x1c0   :  { %v670_v56 = vpop.f32.mrf.mxu0  ;;  %2169 = vst [vmem:[#allocation7 + $0x250] sm:$0xff] %v2073_v63 }
 0x1c1   :  { %v2074_v48 = vpack.c.bf16 %v1958_v44, %v1957_v53  ;;  %v1335_v59 = vadd.f32 %v670_v56, %v298_v35  ;;  %v831_v0 = vpop.f32.mrf.mxu1  ;;  %v1584_v35 = vunpack.c.0.s8 %v3234_v39  ;;  %v308_v53 = vunpack.c.l.bf16 %v131_v46 }
 0x1c2   :  { %v1336_v57 = vadd.f32 %v831_v0, %v299_v51  ;;  %v1777_v0 = vcvt.s32.f32 %v1585_v24  ;;  %v1778_v1 = vcvt.s32.f32 %v1586_v41  ;;  %v1782_v36 = vcvt.s32.f32 %v1590_v8 }
 0x1c3   :  { %2170 = vst [vmem:[#allocation7 + $0x258] sm:$0xff] %v2074_v48  ;;  %v1959_v29 = vmul.f32 %v1767_v40, %v1335_v59  ;;  %v992_v9 = vpop.f32.mrf.mxu2  ;;  %v1776_v56 = vcvt.s32.f32 %v1584_v35  ;;  %v132_v48 = vld [vmem:[#allocation2 + $0x290] sm:$0xff]  ;;  %v1593_v35 = vunpack.c.2.s8 %v3239_v50  ;;  %v1594_v24 = vunpack.c.2.s8 %v3244_v32 }
 0x1c4   :  { %v1153_v61 = vpop.f32.mrf.mxu3  ;;  %v1960_v26 = vmul.f32 %v1768_v60, %v1336_v57  ;;  %v1337_v15 = vadd.f32 %v992_v9, %v300_v58  ;;  %v309_v58 = vunpack.c.h.bf16 %v131_v46  ;;  %v1587_v60 = vunpack.c.1.s8 %v3228_v14 }
 0x1c5   :  { %v1338_v28 = vadd.f32 %v1153_v61, %v301_v62 }
 0x1c6   :  { %v2075_v10 = vpack.c.bf16 %v1960_v26, %v1959_v29  ;;  %v1961_v23 = vmul.f32 %v1769_v4, %v1337_v15  ;;  %v310_v4 = vunpack.c.l.bf16 %v132_v48  ;;  %v133_v26 = vld [vmem:[#allocation2 + $0x298] sm:$0xff]  ;;  %v1779_v15 = vcvt.s32.f32 %v1587_v60 }
 0x1c7   :  { %v1962_v12 = vmul.f32 %v1770_v6, %v1338_v28  ;;  %v311_v28 = vunpack.c.h.bf16 %v132_v48  ;;  %v1786_v60 = vcvt.s32.f32 %v1594_v24 }
 0x1c8   :  { %v673_v16 = vpop.f32.mrf.mxu0  ;;  %2171 = vst [vmem:[#allocation7 + $0x260] sm:$0xff] %v2075_v10 }
 0x1c9   :  { %v2076_v18 = vpack.c.bf16 %v1962_v12, %v1961_v23  ;;  %v1339_v45 = vadd.f32 %v673_v16, %v302_v11  ;;  %v834_v21 = vpop.f32.mrf.mxu1  ;;  %v1588_v11 = vunpack.c.1.s8 %v3234_v39  ;;  %v312_v23 = vunpack.c.l.bf16 %v133_v26 }
 0x1ca   :  { %v1340_v38 = vadd.f32 %v834_v21, %v303_v7  ;;  %v1781_v21 = vcvt.s32.f32 %v1589_v2  ;;  %v3264_v2 = vld [vmem:[%s3306_s3 + $0x160] sm:$0xff] }
 0x1cb   :  { %2172 = vst [vmem:[#allocation7 + $0x268] sm:$0xff] %v2076_v18  ;;  %v1963_v22 = vmul.f32 %v1771_v5, %v1339_v45  ;;  %v995_v30 = vpop.f32.mrf.mxu2  ;;  %v1780_v16 = vcvt.s32.f32 %v1588_v11  ;;  %v134_v18 = vld [vmem:[#allocation2 + $0x2a0] sm:$0xff]  ;;  %v1597_v11 = vunpack.c.3.s8 %v3239_v50  ;;  %v1599_v50 = vunpack.c.0.s8 %v3264_v2 }
 0x1cc   :  { %v1156_v31 = vpop.f32.mrf.mxu3  ;;  %v1964_v43 = vmul.f32 %v1772_v19, %v1340_v38  ;;  %v1341_v33 = vadd.f32 %v995_v30, %v304_v17  ;;  %v313_v17 = vunpack.c.h.bf16 %v133_v26  ;;  %v1591_v19 = vunpack.c.2.s8 %v3228_v14 }
 0x1cd   :  { %v1342_v54 = vadd.f32 %v1156_v31, %v305_v20 }
 0x1ce   :  { %v2077_v49 = vpack.c.bf16 %v1964_v43, %v1963_v22  ;;  %v1965_v40 = vmul.f32 %v1773_v25, %v1341_v33  ;;  %v314_v25 = vunpack.c.l.bf16 %v134_v18  ;;  %v135_v43 = vld [vmem:[#allocation2 + $0x2a8] sm:$0xff]  ;;  %v1783_v33 = vcvt.s32.f32 %v1591_v19 }
 0x1cf   :  { %v1966_v51 = vmul.f32 %v1774_v27, %v1342_v54  ;;  %v315_v54 = vunpack.c.h.bf16 %v134_v18 }
 0x1d0   :  { %v676_v63 = vpop.f32.mrf.mxu0  ;;  %2173 = vst [vmem:[#allocation7 + $0x270] sm:$0xff] %v2077_v49 }
 0x1d1   :  { %v2078_v44 = vpack.c.bf16 %v1966_v51, %v1965_v40  ;;  %v1343_v55 = vadd.f32 %v676_v63, %v306_v42  ;;  %v837_v59 = vpop.f32.mrf.mxu1  ;;  %v1592_v42 = vunpack.c.2.s8 %v3234_v39  ;;  %v316_v40 = vunpack.c.l.bf16 %v135_v43 }
 0x1d2   :  { %v1344_v52 = vadd.f32 %v837_v59, %v307_v37  ;;  %v1785_v59 = vcvt.s32.f32 %v1593_v35 }
 0x1d3   :  { %2174 = vst [vmem:[#allocation7 + $0x278] sm:$0xff] %v2078_v44  ;;  %v1967_v62 = vmul.f32 %v1775_v47, %v1343_v55  ;;  %v998_v29 = vpop.f32.mrf.mxu2  ;;  %v1784_v63 = vcvt.s32.f32 %v1592_v42  ;;  %v136_v44 = vld [vmem:[#allocation2 + $0x2b0] sm:$0xff] }
 0x1d4   :  { %v1159_v57 = vpop.f32.mrf.mxu3  ;;  %v1968_v6 = vmul.f32 %v1776_v56, %v1344_v52  ;;  %v1345_v9 = vadd.f32 %v998_v29, %v308_v53  ;;  %v317_v53 = vunpack.c.h.bf16 %v135_v43  ;;  %v1595_v56 = vunpack.c.3.s8 %v3228_v14 }
 0x1d5   :  { %v1346_v61 = vadd.f32 %v1159_v57, %v309_v58 }
 0x1d6   :  { %v2079_v3 = vpack.c.bf16 %v1968_v6, %v1967_v62  ;;  %v1969_v5 = vmul.f32 %v1777_v0, %v1345_v9  ;;  %v318_v0 = vunpack.c.l.bf16 %v136_v44  ;;  %v137_v6 = vld [vmem:[#allocation2 + $0x2b8] sm:$0xff]  ;;  %v1787_v9 = vcvt.s32.f32 %v1595_v56 }
 0x1d7   :  { %v1970_v7 = vmul.f32 %v1778_v1, %v1346_v61  ;;  %v319_v61 = vunpack.c.h.bf16 %v136_v44 }
 0x1d8   :  { %v679_v10 = vpop.f32.mrf.mxu0  ;;  %2175 = vst [vmem:[#allocation7 + $0x280] sm:$0xff] %v2079_v3 }
 0x1d9   :  { %v2080_v12 = vpack.c.bf16 %v1970_v7, %v1969_v5  ;;  %v1347_v13 = vadd.f32 %v679_v10, %v310_v4  ;;  %v840_v45 = vpop.f32.mrf.mxu1  ;;  %v1596_v4 = vunpack.c.3.s8 %v3234_v39  ;;  %v320_v5 = vunpack.c.l.bf16 %v137_v6 }
 0x1da   :  { %v1348_v34 = vadd.f32 %v840_v45, %v311_v28  ;;  %v1598_v28 = vunpack.c.3.s8 %v3244_v32  ;;  %v321_v10 = vunpack.c.h.bf16 %v137_v6  ;;  %v3270_v32 = vld [vmem:[%s3306_s3 + $0x168] sm:$0xff]  ;;  %v3275_v45 = vld [vmem:[%s3306_s3 + $0x170] sm:$0xff] }
 0x1db   :  { %2176 = vst [vmem:[#allocation7 + $0x288] sm:$0xff] %v2080_v12  ;;  %v1971_v20 = vmul.f32 %v1779_v15, %v1347_v13  ;;  %v1001_v22 = vpop.f32.mrf.mxu2  ;;  %v1788_v8 = vcvt.s32.f32 %v1596_v4  ;;  %v1601_v42 = vunpack.c.0.s8 %v3275_v45  ;;  %v1605_v4 = vunpack.c.1.s8 %v3275_v45 }
 0x1dc   :  { %v1162_v38 = vpop.f32.mrf.mxu3  ;;  %v1972_v27 = vmul.f32 %v1780_v16, %v1348_v34  ;;  %v1349_v30 = vadd.f32 %v1001_v22, %v312_v23  ;;  %v138_v23 = vld [vmem:[#allocation2 + $0x2c0] sm:$0xff]  ;;  %v1790_v18 = vcvt.s32.f32 %v1598_v28 }
 0x1dd   :  { %v1350_v31 = vadd.f32 %v1162_v38, %v313_v17  ;;  %v1789_v17 = vcvt.s32.f32 %v1597_v11  ;;  %v322_v34 = vunpack.c.l.bf16 %v138_v23 }
 0x1de   :  { %v2081_v46 = vpack.c.bf16 %v1972_v27, %v1971_v20  ;;  %v1973_v47 = vmul.f32 %v1781_v21, %v1349_v30  ;;  %v3280_v21 = vld [vmem:[%s3306_s3 + $0x178] sm:$0xff]  ;;  %v139_v27 = vld [vmem:[#allocation2 + $0x2c8] sm:$0xff]  ;;  %v1791_v30 = vcvt.s32.f32 %v1599_v50  ;;  %s2494_s3 = smov [#allocation7]  }
 0x1df   :  { %v1974_v37 = vmul.f32 %v1782_v36, %v1350_v31  ;;  %v323_v31 = vunpack.c.h.bf16 %v138_v23  ;;  %v1602_v35 = vunpack.c.0.s8 %v3280_v21  ;;  %v1606_v11 = vunpack.c.1.s8 %v3280_v21  ;;  %s2195_s9 = sshll.u32 %s2494_s3, 4  ;;  %s2196_s9 = int_to_ptr.vmem [resolvable:$true] %s2195_s9 }
 0x1e0   :  { %v682_v49 = vpop.f32.mrf.mxu0  ;;  %2177 = vst [vmem:[#allocation7 + $0x290] sm:$0xff] %v2081_v46 }
 0x1e1   :  { %v2082_v51 = vpack.c.bf16 %v1974_v37, %v1973_v47  ;;  %v1351_v41 = vadd.f32 %v682_v49, %v314_v25  ;;  %v843_v55 = vpop.f32.mrf.mxu1  ;;  %v1600_v25 = vunpack.c.0.s8 %v3270_v32  ;;  %v324_v47 = vunpack.c.l.bf16 %v139_v27 }
 0x1e2   :  { %v1352_v48 = vadd.f32 %v843_v55, %v315_v54  ;;  %v1793_v55 = vcvt.s32.f32 %v1601_v42  ;;  %v1794_v56 = vcvt.s32.f32 %v1602_v35  ;;  %v1798_v50 = vcvt.s32.f32 %v1606_v11 }
 0x1e3   :  { %2178 = vst [vmem:[#allocation7 + $0x298] sm:$0xff] %v2082_v51  ;;  %v1975_v58 = vmul.f32 %v1783_v33, %v1351_v41  ;;  %v1004_v62 = vpop.f32.mrf.mxu2  ;;  %v1792_v49 = vcvt.s32.f32 %v1600_v25  ;;  %v140_v51 = vld [vmem:[#allocation2 + $0x2d0] sm:$0xff]  ;;  %v1609_v25 = vunpack.c.2.s8 %v3275_v45  ;;  %v1610_v42 = vunpack.c.2.s8 %v3280_v21 }
 0x1e4   :  { %v1165_v52 = vpop.f32.mrf.mxu3  ;;  %v1976_v1 = vmul.f32 %v1784_v63, %v1352_v48  ;;  %v1353_v29 = vadd.f32 %v1004_v62, %v316_v40  ;;  %v325_v40 = vunpack.c.h.bf16 %v139_v27  ;;  %v1603_v63 = vunpack.c.1.s8 %v3264_v2 }
 0x1e5   :  { %v1354_v57 = vadd.f32 %v1165_v52, %v317_v53 }
 0x1e6   :  { %v2083_v26 = vpack.c.bf16 %v1976_v1, %v1975_v58  ;;  %v1977_v14 = vmul.f32 %v1785_v59, %v1353_v29  ;;  %v326_v59 = vunpack.c.l.bf16 %v140_v51  ;;  %v141_v1 = vld [vmem:[#allocation2 + $0x2d8] sm:$0xff]  ;;  %v1795_v29 = vcvt.s32.f32 %v1603_v63 }
 0x1e7   :  { %v1978_v15 = vmul.f32 %v1786_v60, %v1354_v57  ;;  %v327_v57 = vunpack.c.h.bf16 %v140_v51  ;;  %v1802_v63 = vcvt.s32.f32 %v1610_v42 }
 0x1e8   :  { %v685_v3 = vpop.f32.mrf.mxu0  ;;  %2179 = vst [vmem:[#allocation7 + $0x2a0] sm:$0xff] %v2083_v26 }
 0x1e9   :  { %v2084_v7 = vpack.c.bf16 %v1978_v15, %v1977_v14  ;;  %v1355_v39 = vadd.f32 %v685_v3, %v318_v0  ;;  %v846_v12 = vpop.f32.mrf.mxu1  ;;  %v1604_v0 = vunpack.c.1.s8 %v3270_v32  ;;  %v328_v14 = vunpack.c.l.bf16 %v141_v1 }
 0x1ea   :  { %v1356_v16 = vadd.f32 %v846_v12, %v319_v61  ;;  %v1797_v12 = vcvt.s32.f32 %v1605_v4 }
 0x1eb   :  { %2180 = vst [vmem:[#allocation7 + $0x2a8] sm:$0xff] %v2084_v7  ;;  %v1979_v13 = vmul.f32 %v1787_v9, %v1355_v39  ;;  %v1007_v19 = vpop.f32.mrf.mxu2  ;;  %v1796_v3 = vcvt.s32.f32 %v1604_v0  ;;  %v142_v7 = vld [vmem:[#allocation2 + $0x2e0] sm:$0xff]  ;;  %v1613_v0 = vunpack.c.3.s8 %v3275_v45 }
 0x1ec   :  { %v1168_v20 = vpop.f32.mrf.mxu3  ;;  %v1980_v36 = vmul.f32 %v1788_v8, %v1356_v16  ;;  %v1357_v22 = vadd.f32 %v1007_v19, %v320_v5  ;;  %v329_v5 = vunpack.c.h.bf16 %v141_v1  ;;  %v1607_v8 = vunpack.c.2.s8 %v3264_v2 }
 0x1ed   :  { %v1358_v38 = vadd.f32 %v1168_v20, %v321_v10 }
 0x1ee   :  { %v2085_v43 = vpack.c.bf16 %v1980_v36, %v1979_v13  ;;  %v1981_v33 = vmul.f32 %v1789_v17, %v1357_v22  ;;  %v330_v17 = vunpack.c.l.bf16 %v142_v7  ;;  %v143_v36 = vld [vmem:[#allocation2 + $0x2e8] sm:$0xff]  ;;  %v1799_v22 = vcvt.s32.f32 %v1607_v8 }
 0x1ef   :  { %v1982_v54 = vmul.f32 %v1790_v18, %v1358_v38  ;;  %v331_v38 = vunpack.c.h.bf16 %v142_v7 }
 0x1f0   :  { %v688_v46 = vpop.f32.mrf.mxu0  ;;  %2181 = vst [vmem:[#allocation7 + $0x2b0] sm:$0xff] %v2085_v43 }
 0x1f1   :  { %v2086_v37 = vpack.c.bf16 %v1982_v54, %v1981_v33  ;;  %v1359_v24 = vadd.f32 %v688_v46, %v322_v34  ;;  %v849_v41 = vpop.f32.mrf.mxu1  ;;  %v1608_v34 = vunpack.c.2.s8 %v3270_v32  ;;  %v332_v33 = vunpack.c.l.bf16 %v143_v36 }
 0x1f2   :  { %v1360_v44 = vadd.f32 %v849_v41, %v323_v31  ;;  %v1801_v41 = vcvt.s32.f32 %v1609_v25 }
 0x1f3   :  { %2182 = vst [vmem:[#allocation7 + $0x2b8] sm:$0xff] %v2086_v37  ;;  %v1983_v53 = vmul.f32 %v1791_v30, %v1359_v24  ;;  %v1010_v58 = vpop.f32.mrf.mxu2  ;;  %v1800_v46 = vcvt.s32.f32 %v1608_v34  ;;  %v144_v37 = vld [vmem:[#allocation2 + $0x2f0] sm:$0xff] }
 0x1f4   :  { %v1171_v48 = vpop.f32.mrf.mxu3  ;;  %v1984_v60 = vmul.f32 %v1792_v49, %v1360_v44  ;;  %v1361_v62 = vadd.f32 %v1010_v58, %v324_v47  ;;  %v333_v47 = vunpack.c.h.bf16 %v143_v36  ;;  %v1611_v49 = vunpack.c.3.s8 %v3264_v2 }
 0x1f5   :  { %v1362_v52 = vadd.f32 %v1171_v48, %v325_v40 }
 0x1f6   :  { %v2087_v6 = vpack.c.bf16 %v1984_v60, %v1983_v53  ;;  %v1985_v9 = vmul.f32 %v1793_v55, %v1361_v62  ;;  %v334_v55 = vunpack.c.l.bf16 %v144_v37  ;;  %v145_v60 = vld [vmem:[#allocation2 + $0x2f8] sm:$0xff]  ;;  %v1803_v62 = vcvt.s32.f32 %v1611_v49 }
 0x1f7   :  { %v1986_v61 = vmul.f32 %v1794_v56, %v1362_v52  ;;  %v335_v52 = vunpack.c.h.bf16 %v144_v37 }
 0x1f8   :  { %v691_v26 = vpop.f32.mrf.mxu0  ;;  %2183 = vst [vmem:[#allocation7 + $0x2c0] sm:$0xff] %v2087_v6  ;;  %v336_v6 = vunpack.c.l.bf16 %v145_v60 }
 0x1f9   :  { %v2088_v15 = vpack.c.bf16 %v1986_v61, %v1985_v9  ;;  %v1363_v28 = vadd.f32 %v691_v26, %v326_v59  ;;  %v852_v39 = vpop.f32.mrf.mxu1  ;;  %v1612_v59 = vunpack.c.3.s8 %v3270_v32  ;;  %v337_v26 = vunpack.c.h.bf16 %v145_v60 }
 0x1fa   :  { %v1364_v23 = vadd.f32 %v852_v39, %v327_v57  ;;  %v1614_v57 = vunpack.c.3.s8 %v3280_v21 }
 0x1fb   :  { %2184 = vst [vmem:[#allocation7 + $0x2c8] sm:$0xff] %v2088_v15  ;;  %v1987_v10 = vmul.f32 %v1795_v29, %v1363_v28  ;;  %v1013_v13 = vpop.f32.mrf.mxu2  ;;  %v1804_v11 = vcvt.s32.f32 %v1612_v59  ;;  %v1805_v28 = vcvt.s32.f32 %v1613_v0 }
 0x1fc   :  { %v1174_v16 = vpop.f32.mrf.mxu3  ;;  %v1988_v18 = vmul.f32 %v1796_v3, %v1364_v23  ;;  %v1365_v19 = vadd.f32 %v1013_v13, %v328_v14  ;;  %v1806_v3 = vcvt.s32.f32 %v1614_v57 }
 0x1fd   :  { %v1366_v20 = vadd.f32 %v1174_v16, %v329_v5 }
 0x1fe   :  { %v2089_v27 = vpack.c.bf16 %v1988_v18, %v1987_v10  ;;  %v1989_v30 = vmul.f32 %v1797_v12, %v1365_v19 }
 0x1ff   :  { %v1990_v31 = vmul.f32 %v1798_v50, %v1366_v20 }
 0x200   :  { %v694_v43 = vpop.f32.mrf.mxu0  ;;  %2185 = vst [vmem:[#allocation7 + $0x2d0] sm:$0xff] %v2089_v27 }
 0x201   :  { %v2090_v54 = vpack.c.bf16 %v1990_v31, %v1989_v30  ;;  %v1367_v35 = vadd.f32 %v694_v43, %v330_v17  ;;  %v855_v24 = vpop.f32.mrf.mxu1 }
 0x202   :  { %v1368_v51 = vadd.f32 %v855_v24, %v331_v38 }
 0x203   :  { %2186 = vst [vmem:[#allocation7 + $0x2d8] sm:$0xff] %v2090_v54  ;;  %v1991_v40 = vmul.f32 %v1799_v22, %v1367_v35  ;;  %v1016_v53 = vpop.f32.mrf.mxu2 }
 0x204   :  { %v1177_v44 = vpop.f32.mrf.mxu3  ;;  %v1992_v56 = vmul.f32 %v1800_v46, %v1368_v51  ;;  %v1369_v58 = vadd.f32 %v1016_v53, %v332_v33 }
 0x205   :  { %v1370_v48 = vadd.f32 %v1177_v44, %v333_v47 }
 0x206   :  { %v2091_v1 = vpack.c.bf16 %v1992_v56, %v1991_v40  ;;  %v1993_v2 = vmul.f32 %v1801_v41, %v1369_v58 }
 0x207   :  { %v1994_v29 = vmul.f32 %v1802_v63, %v1370_v48 }
 0x208   :  { %v697_v4 = vpop.f32.mrf.mxu0  ;;  %2187 = vst [vmem:[#allocation7 + $0x2e0] sm:$0xff] %v2091_v1 }
 0x209   :  { %v2092_v9 = vpack.c.bf16 %v1994_v29, %v1993_v2  ;;  %v1371_v61 = vadd.f32 %v697_v4, %v334_v55  ;;  %v858_v14 = vpop.f32.mrf.mxu1 }
 0x20a   :  { %v1372_v15 = vadd.f32 %v858_v14, %v335_v52 }
 0x20b   :  { %2188 = vst [vmem:[#allocation7 + $0x2e8] sm:$0xff] %v2092_v9  ;;  %v1995_v32 = vmul.f32 %v1803_v62, %v1371_v61  ;;  %v1019_v5 = vpop.f32.mrf.mxu2 }
 0x20c   :  { %v1180_v45 = vpop.f32.mrf.mxu3  ;;  %v1996_v7 = vmul.f32 %v1804_v11, %v1372_v15  ;;  %v1373_v39 = vadd.f32 %v1019_v5, %v336_v6 }
 0x20d   :  { %v1374_v8 = vadd.f32 %v1180_v45, %v337_v26 }
 0x20e   :  { %v2093_v21 = vpack.c.bf16 %v1996_v7, %v1995_v32  ;;  %v1997_v10 = vmul.f32 %v1805_v28, %v1373_v39 }
 0x20f   :  { %v1998_v23 = vmul.f32 %v1806_v3, %v1374_v8 }
 0x210   :  { %2189 = vst [vmem:[#allocation7 + $0x2f0] sm:$0xff] %v2093_v21 }
 0x211   :  { %v2094_v12 = vpack.c.bf16 %v1998_v23, %v1997_v10 }
 0x213   :  { %2190 = vst [vmem:[#allocation7 + $0x2f8] sm:$0xff] %v2094_v12 }
 0x214   :  { %2203 = dma.vmem_to_hbm [thread:$0]  %s2196_s9, 12288, %s2198_s12, [#allocation4], %s2489_s23, %s2489_s23, %s2490_s24  }
 0x215   :  { %2486 = dma.done.wait [#allocation4], 12288  }
 0x216   :  { %2487 = vsyncadd [#allocation4], 4294955008 }
 0x217   :  { %2208 = vsyncpa [#allocation3], 1 }
 0x218   :  { %2209 = vsyncpa [#allocation6], 1 }
 0x219   :  { %2210 = vsyncpa [#allocation4], 1 }

</bundles_post_ra>
